<compile_context>
chip_gen: v6e
topology: v6e:2x2x1
jax: 0.10.0
libtpu: 0.0.40
codegen_flags: <defaults>
</compile_context>

<pallas_src>
import jax
import jax.numpy as jnp
from jax import lax
from jax.experimental import pallas as pl
from jax.experimental.pallas import tpu as pltpu

LANE = 128


def _round_up(v, m):
    return ((v + m - 1) // m) * m


def gcn_kernel(a_ref, x_ref, wconv_ref, small_ref, wl1_hbm_ref, o_ref,
               wl1_vmem, cat_vmem, sem):
    # Start the big L1-weight DMA immediately; it overlaps with conv1/conv2 compute.
    wl1_cp = pltpu.make_async_copy(wl1_hbm_ref, wl1_vmem, sem)
    wl1_cp.start()

    a = a_ref[...]                          # [Np, Np] bf16 normalized adjacency
    x = x_ref[...]                          # [Np, 128] bf16 node features (padded)

    small = small_ref[...]                  # [8, 1024] f32 packed small params
    b1 = small[0:1, :LANE]                  # [1, 128]
    b2 = small[1:2, :LANE]                  # [1, 128]
    bl1 = small[2:3, :]                     # [1, 1024]
    wl2_row = small[3:4, :]                 # [1, 1024]  (L2 weight column as a row)
    bl2 = small[4:5, 0:1]                   # [1, 1]

    w1 = wconv_ref[:, 0:LANE]               # [128, 128] bf16
    w2 = wconv_ref[:, LANE:2 * LANE]        # [128, 128] bf16

    # --- GCNConv1: relu((A @ X) @ W1 + b1)  (A@X first: tiny k=Np contraction) ---
    ax = jnp.dot(a, x, preferred_element_type=jnp.float32)           # [Np, 128] f32
    h = jnp.dot(ax.astype(jnp.bfloat16), w1,
                preferred_element_type=jnp.float32) + b1
    h = jnp.maximum(h, 0.0)

    # --- GCNConv2: relu(A @ (H @ W2) + b2) ---
    hw = jnp.dot(h.astype(jnp.bfloat16), w2,
                 preferred_element_type=jnp.float32)
    h2 = jnp.dot(a, hw.astype(jnp.bfloat16),
                 preferred_element_type=jnp.float32) + b2
    h2 = jnp.maximum(h2, 0.0)

    # --- concat([x, h2], dim=1) via two static-slice stores -> one k=256 matmul ---
    cat_vmem[:, 0:LANE] = x
    cat_vmem[:, LANE:2 * LANE] = h2.astype(jnp.bfloat16)

    wl1_cp.wait()                            # fused L1 weight now resident in VMEM
    z = jnp.dot(cat_vmem[...], wl1_vmem[...],
                preferred_element_type=jnp.float32) + bl1             # [Np, 1024] f32
    z = jnp.maximum(z, 0.0)

    # --- L2 head (1024 -> 1): VPU multiply + lane reduce (no padded 1->128 matmul) ---
    out_col = jnp.sum(z * wl2_row, axis=-1, keepdims=True) + bl2      # [Np, 1] f32
    y = jax.nn.sigmoid(out_col)
    o_ref[...] = jnp.broadcast_to(y, o_ref.shape)                     # lane-dense store


def init_params(key, in_channels, hidden_channels, out_channels):
    """Raw (unpadded) parameters, matching the PyTorch module layout."""
    ks = jax.random.split(key, 8)
    s = 0.1
    w1 = s * jax.random.normal(ks[0], (in_channels, hidden_channels), jnp.float32)
    b1 = s * jax.random.normal(ks[1], (hidden_channels,), jnp.float32)
    w2 = s * jax.random.normal(ks[2], (hidden_channels, out_channels), jnp.float32)
    b2 = s * jax.random.normal(ks[3], (out_channels,), jnp.float32)
    # L1 = Linear(out_channels + 10, 1024): rows 0:in_channels act on x (skip),
    # rows in_channels: act on the conv output h2 (in_channels must be 10).
    wl1 = s * jax.random.normal(ks[4], (in_channels + out_channels, 1024), jnp.float32)
    bl1 = s * jax.random.normal(ks[5], (1024,), jnp.float32)
    wl2 = s * jax.random.normal(ks[6], (1024, 1), jnp.float32)
    bl2 = s * jax.random.normal(ks[7], (1,), jnp.float32)
    return (w1, b1, w2, b2, wl1, bl1, wl2, bl2)


def prepare_params(params):
    """One-time padding / bf16-casting / packing (hoisted off the per-call path)."""
    w1, b1, w2, b2, wl1, bl1, wl2, bl2 = params
    in_c, hid = w1.shape
    outc = w2.shape[1]
    l1 = wl1.shape[1]
    assert in_c <= LANE and hid <= LANE and outc <= LANE
    assert wl1.shape[0] == in_c + outc
    l1p = _round_up(l1, LANE)

    # W1 | W2 column-packed into one [128, 256] bf16 buffer.
    wconv = jnp.zeros((LANE, 2 * LANE), jnp.bfloat16)
    wconv = wconv.at[:in_c, :hid].set(w1.astype(jnp.bfloat16))
    wconv = wconv.at[:hid, LANE:LANE + outc].set(w2.astype(jnp.bfloat16))

    # Fused L1 weight for the k=256 concat matmul: rows [0:in_c] act on x,
    # rows [128:128+outc] act on h2; everything else is zero padding.
    wl1_f = jnp.zeros((2 * LANE, l1p), jnp.bfloat16)
    wl1_f = wl1_f.at[:in_c, :l1].set(wl1[:in_c].astype(jnp.bfloat16))
    wl1_f = wl1_f.at[LANE:LANE + outc, :l1].set(wl1[in_c:].astype(jnp.bfloat16))

    # Small f32 params packed into one [8, l1p] buffer (single DMA):
    #   row 0: b1, row 1: b2, row 2: bL1, row 3: wL2 column (as a row), row 4[0]: bL2
    small = jnp.zeros((8, l1p), jnp.float32)
    small = small.at[0, :hid].set(b1.reshape(-1))
    small = small.at[1, :outc].set(b2.reshape(-1))
    small = small.at[2, :l1].set(bl1.reshape(-1))
    small = small.at[3, :l1].set(wl2.reshape(-1))
    small = small.at[4, 0].set(jnp.reshape(bl2, ()))

    return (wconv, wl1_f, small)


def gcn_forward(x, edge_index, packed):
    """x: [N, in_channels] f32, edge_index: [2, E] int32, packed: prepare_params(...)."""
    wconv, wl1_f, small = packed
    n, f = x.shape
    l1p = wl1_f.shape[1]

    # Node dim padded only to a sublane multiple (bf16 packs 16 rows per vreg).
    np_ = max(32, _round_up(n, 16))
    fp = LANE

    # ---- glue (plain JAX): A_hat = D^-1/2 (A+I) D^-1/2, built once in the padded buffer ----
    # Multi-edges scatter-ADD (PyG semantics); self-loops added only where missing,
    # and only for real nodes (padded rows stay all-zero).
    src, dst = edge_index[0], edge_index[1]
    a = jnp.zeros((np_, np_), jnp.float32).at[dst, src].add(1.0)
    diag = jnp.diagonal(a)
    add_self = jnp.where((jnp.arange(np_) < n) & (diag <= 0.0), 1.0, 0.0)
    a = a + jnp.diag(add_self)
    deg = a.sum(axis=1)
    d_inv_sqrt = jnp.where(deg > 0, lax.rsqrt(deg), 0.0)
    a_hat = (a * d_inv_sqrt[:, None] * d_inv_sqrt[None, :]).astype(jnp.bfloat16)

    x_p = jnp.zeros((np_, fp), jnp.bfloat16).at[:n, :f].set(x.astype(jnp.bfloat16))

    operands = (a_hat, x_p, wconv, small, wl1_f)
    flops = 2 * np_ * (np_ * fp + fp * LANE + LANE * LANE + np_ * LANE
                       + 2 * LANE * l1p + l1p)
    bytes_accessed = sum(int(o.size) * o.dtype.itemsize for o in operands) + np_ * LANE * 4
    cost = pl.CostEstimate(flops=flops, transcendentals=np_, bytes_accessed=bytes_accessed)

    vmem = pl.BlockSpec(memory_space=pltpu.MemorySpace.VMEM)
    y_pad = pl.pallas_call(
        gcn_kernel,
        out_shape=jax.ShapeDtypeStruct((np_, LANE), jnp.float32),
        in_specs=[
            vmem,                                # A_hat
            vmem,                                # x
            vmem,                                # packed conv weights [128,256]
            vmem,                                # packed small f32 params [8,1024]
            pl.BlockSpec(memory_space=pl.ANY),   # fused L1 weight stays in HBM; DMA'd in-kernel
        ],
        out_specs=vmem,
        scratch_shapes=[
            pltpu.VMEM((2 * LANE, l1p), jnp.bfloat16),   # L1 weight landing buffer
            pltpu.VMEM((np_, 2 * LANE), jnp.bfloat16),   # concat([x, h2]) buffer
            pltpu.SemaphoreType.DMA(()),
        ],
        cost_estimate=cost,
    )(*operands)
    # TODO(synk): for large N, grid over node-row tiles (columns/reduction axis
    # "arbitrary") and budget tiles against v7x's 64 MiB VMEM / v5e's 16 MiB default
    # scoped limit (set pltpu.CompilerParams(vmem_limit_bytes=...)).
    return y_pad[:n, :1]


if __name__ == "__main__":
    key = jax.random.PRNGKey(0)
    k_x, k_e, k_p = jax.random.split(key, 3)

    N = 16            # number of graph nodes
    E = 40            # number of edges
    in_channels = 10  # fixed by L1 = Linear(out_channels + 10, 1024)
    hidden_channels = 32
    out_channels = 16

    x = jax.random.normal(k_x, (N, in_channels), jnp.float32)
    edge_index = jax.random.randint(k_e, (2, E), 0, N, dtype=jnp.int32)
    params = init_params(k_p, in_channels, hidden_channels, out_channels)
    packed = prepare_params(params)          # one-time packing, off the per-call path

    fwd = jax.jit(gcn_forward)
    y = fwd(x, edge_index, packed)
    jax.block_until_ready(y)
    assert y.shape == (N, 1)
    assert bool(jnp.all((y >= 0.0) & (y <= 1.0)))
    print("KERNEL_OK")
</pallas_src>

<mosaic_0001>
module attributes {stable_mosaic.version = 11 : i64} {
  func.func private @main(%arg0: i32) attributes {dimension_semantics = [#tpu.dimension_semantics<core_parallel>], iteration_bounds = array<i64: 2>, tpu.core_type = #tpu.core_type<sc_scalar_subcore>, window_params = []} {
    return
  }
}

module attributes {stable_mosaic.version = 11 : i64} {
  func.func private @main(%arg0: i32) attributes {dimension_semantics = [#tpu.dimension_semantics<core_parallel>], iteration_bounds = array<i64: 2>, tpu.core_type = #tpu.core_type<sc_scalar_subcore>, window_params = []} {
    return
  }
}

module attributes {stable_mosaic.version = 11 : i64} {
  func.func @gcn_kernel(%arg0: memref<32x32xbf16, #tpu.memory_space<vmem>>, %arg1: memref<32x128xbf16, #tpu.memory_space<vmem>>, %arg2: memref<128x256xbf16, #tpu.memory_space<vmem>>, %arg3: memref<8x1024xf32, #tpu.memory_space<vmem>>, %arg4: memref<256x1024xbf16, #tpu.memory_space<any>>, %arg5: memref<32x128xf32, #tpu.memory_space<vmem>>, %arg6: memref<256x1024xbf16, #tpu.memory_space<vmem>>, %arg7: memref<32x256xbf16, #tpu.memory_space<vmem>>, %arg8: memref<!tpu.dma_semaphore, #tpu.memory_space<semaphore_mem>>) attributes {dimension_semantics = [], scalar_prefetch = 0 : i64, scratch_operands = 3 : i64, tpu.core_type = #tpu.core_type<tc>} {
    tpu.enqueue_dma source(%arg4 : memref<256x1024xbf16, #tpu.memory_space<any>>) target(%arg6 : memref<256x1024xbf16, #tpu.memory_space<vmem>>) target_semaphore(%arg8 : memref<!tpu.dma_semaphore, #tpu.memory_space<semaphore_mem>>)
    %c0 = arith.constant 0 : index
    %c0_0 = arith.constant 0 : index
    %0 = vector.load %arg0[%c0, %c0_0] : memref<32x32xbf16, #tpu.memory_space<vmem>>, vector<32x32xbf16>
    %c0_1 = arith.constant 0 : index
    %c0_2 = arith.constant 0 : index
    %1 = vector.load %arg1[%c0_1, %c0_2] : memref<32x128xbf16, #tpu.memory_space<vmem>>, vector<32x128xbf16>
    %c0_3 = arith.constant 0 : index
    %c0_4 = arith.constant 0 : index
    %2 = vector.load %arg3[%c0_3, %c0_4] : memref<8x1024xf32, #tpu.memory_space<vmem>>, vector<8x1024xf32>
    %3 = vector.extract_strided_slice %2 {offsets = [0, 0], sizes = [1, 128], strides = [1, 1]} : vector<8x1024xf32> to vector<1x128xf32>
    %4 = vector.extract_strided_slice %2 {offsets = [1, 0], sizes = [1, 128], strides = [1, 1]} : vector<8x1024xf32> to vector<1x128xf32>
    %5 = vector.extract_strided_slice %2 {offsets = [2, 0], sizes = [1, 1024], strides = [1, 1]} : vector<8x1024xf32> to vector<1x1024xf32>
    %6 = vector.extract_strided_slice %2 {offsets = [3, 0], sizes = [1, 1024], strides = [1, 1]} : vector<8x1024xf32> to vector<1x1024xf32>
    %7 = vector.extract_strided_slice %2 {offsets = [4, 0], sizes = [1, 1], strides = [1, 1]} : vector<8x1024xf32> to vector<1x1xf32>
    %c0_5 = arith.constant 0 : index
    %c0_6 = arith.constant 0 : index
    %8 = vector.load %arg2[%c0_5, %c0_6] : memref<128x256xbf16, #tpu.memory_space<vmem>>, vector<128x128xbf16>
    %c0_7 = arith.constant 0 : index
    %c128 = arith.constant 128 : index
    %9 = vector.load %arg2[%c0_7, %c128] : memref<128x256xbf16, #tpu.memory_space<vmem>>, vector<128x128xbf16>
    %cst = arith.constant dense<0.000000e+00> : vector<32x128xf32>
    %10 = tpu.matmul %0, %1, %cst {dimension_numbers = #tpu.dot_dimension_numbers<[1], [0], [0], [1], [0, 0, 1, 1], [], []>} : vector<32x32xbf16>, vector<32x128xbf16>, vector<32x128xf32> -> vector<32x128xf32>
    %11 = arith.truncf %10 : vector<32x128xf32> to vector<32x128xbf16>
    %cst_8 = arith.constant dense<0.000000e+00> : vector<32x128xf32>
    %12 = tpu.matmul %11, %8, %cst_8 {dimension_numbers = #tpu.dot_dimension_numbers<[1], [0], [0], [1], [0, 0, 1, 1], [], []>} : vector<32x128xbf16>, vector<128x128xbf16>, vector<32x128xf32> -> vector<32x128xf32>
    %13 = vector.broadcast %3 : vector<1x128xf32> to vector<32x128xf32>
    %14 = arith.addf %12, %13 : vector<32x128xf32>
    %cst_9 = arith.constant 0.000000e+00 : f32
    %15 = vector.broadcast %cst_9 : f32 to vector<32x128xf32>
    %16 = arith.maximumf %14, %15 : vector<32x128xf32>
    %17 = arith.truncf %16 : vector<32x128xf32> to vector<32x128xbf16>
    %cst_10 = arith.constant dense<0.000000e+00> : vector<32x128xf32>
    %18 = tpu.matmul %17, %9, %cst_10 {dimension_numbers = #tpu.dot_dimension_numbers<[1], [0], [0], [1], [0, 0, 1, 1], [], []>} : vector<32x128xbf16>, vector<128x128xbf16>, vector<32x128xf32> -> vector<32x128xf32>
    %19 = arith.truncf %18 : vector<32x128xf32> to vector<32x128xbf16>
    %cst_11 = arith.constant dense<0.000000e+00> : vector<32x128xf32>
    %20 = tpu.matmul %0, %19, %cst_11 {dimension_numbers = #tpu.dot_dimension_numbers<[1], [0], [0], [1], [0, 0, 1, 1], [], []>} : vector<32x32xbf16>, vector<32x128xbf16>, vector<32x128xf32> -> vector<32x128xf32>
    %21 = vector.broadcast %4 : vector<1x128xf32> to vector<32x128xf32>
    %22 = arith.addf %20, %21 : vector<32x128xf32>
    %cst_12 = arith.constant 0.000000e+00 : f32
    %23 = vector.broadcast %cst_12 : f32 to vector<32x128xf32>
    %24 = arith.maximumf %22, %23 : vector<32x128xf32>
    %c0_13 = arith.constant 0 : index
    %c0_14 = arith.constant 0 : index
    %25 = vector.load %arg7[%c0_13, %c0_14] : memref<32x256xbf16, #tpu.memory_space<vmem>>, vector<32x128xbf16>
    tpu.vector_store %arg7[%c0_13, %c0_14], %1 {strides = array<i32>} : memref<32x256xbf16, #tpu.memory_space<vmem>>, vector<32x128xbf16>,
    %26 = arith.truncf %24 : vector<32x128xf32> to vector<32x128xbf16>
    %c0_15 = arith.constant 0 : index
    %c128_16 = arith.constant 128 : index
    %27 = vector.load %arg7[%c0_15, %c128_16] : memref<32x256xbf16, #tpu.memory_space<vmem>>, vector<32x128xbf16>
    tpu.vector_store %arg7[%c0_15, %c128_16], %26 {strides = array<i32>} : memref<32x256xbf16, #tpu.memory_space<vmem>>, vector<32x128xbf16>,
    tpu.wait_dma2 semaphore(%arg8 : memref<!tpu.dma_semaphore, #tpu.memory_space<semaphore_mem>>) src(%arg4 : memref<256x1024xbf16, #tpu.memory_space<any>>) dst(%arg6 : memref<256x1024xbf16, #tpu.memory_space<vmem>>)
    %c0_17 = arith.constant 0 : index
    %c0_18 = arith.constant 0 : index
    %28 = vector.load %arg7[%c0_17, %c0_18] : memref<32x256xbf16, #tpu.memory_space<vmem>>, vector<32x256xbf16>
    %c0_19 = arith.constant 0 : index
    %c0_20 = arith.constant 0 : index
    %29 = vector.load %arg6[%c0_19, %c0_20] : memref<256x1024xbf16, #tpu.memory_space<vmem>>, vector<256x1024xbf16>
    %cst_21 = arith.constant dense<0.000000e+00> : vector<32x1024xf32>
    %30 = tpu.matmul %28, %29, %cst_21 {dimension_numbers = #tpu.dot_dimension_numbers<[1], [0], [0], [1], [0, 0, 1, 1], [], []>} : vector<32x256xbf16>, vector<256x1024xbf16>, vector<32x1024xf32> -> vector<32x1024xf32>
    %31 = vector.broadcast %5 : vector<1x1024xf32> to vector<32x1024xf32>
    %32 = arith.addf %30, %31 : vector<32x1024xf32>
    %cst_22 = arith.constant 0.000000e+00 : f32
    %33 = vector.broadcast %cst_22 : f32 to vector<32x1024xf32>
    %34 = arith.maximumf %32, %33 : vector<32x1024xf32>
    %35 = vector.broadcast %6 : vector<1x1024xf32> to vector<32x1024xf32>
    %36 = arith.mulf %34, %35 : vector<32x1024xf32>
    %cst_23 = arith.constant dense<0.000000e+00> : vector<32xf32>
    %37 = vector.multi_reduction <add>, %36, %cst_23 [1] : vector<32x1024xf32> to vector<32xf32>
    %38 = vector.shape_cast %37 : vector<32xf32> to vector<32x1xf32>
    %39 = vector.broadcast %7 : vector<1x1xf32> to vector<32x1xf32>
    %40 = arith.addf %38, %39 : vector<32x1xf32>
    %41 = arith.negf %40 : vector<32x1xf32>
    %42 = math.exp %41 : vector<32x1xf32>
    %cst_24 = arith.constant 1.000000e+00 : f32
    %43 = vector.broadcast %cst_24 : f32 to vector<32x1xf32>
    %44 = arith.addf %43, %42 : vector<32x1xf32>
    %45 = arith.divf %43, %44 : vector<32x1xf32>
    %46 = vector.shape_cast %45 : vector<32x1xf32> to vector<32x1xf32>
    %47 = vector.broadcast %46 : vector<32x1xf32> to vector<32x128xf32>
    %c0_25 = arith.constant 0 : index
    %c0_26 = arith.constant 0 : index
    %48 = vector.load %arg5[%c0_25, %c0_26] : memref<32x128xf32, #tpu.memory_space<vmem>>, vector<32x128xf32>
    tpu.vector_store %arg5[%c0_25, %c0_26], %47 {strides = array<i32>} : memref<32x128xf32, #tpu.memory_space<vmem>>, vector<32x128xf32>,
    return
  }
}

</mosaic_0001>

<bundles_post_ra>
// kernel: gcn_forward.1
= control target key start
LH: loop header
LB: loop body
LE: loop exit
PB: predicated region body
PF: predicated region fallthrough
CT: control target
= control target key end

     0   :  { %s3456_s0 = inlined_call_operand.vmem [shape: bf16[32,32], index: 0, kind: input, shape index: {}]   ;;  %s3457_s1 = inlined_call_operand.vmem [shape: bf16[32,128], index: 1, kind: input, shape index: {}]   ;;  %s3458_s2 = inlined_call_operand.vmem [shape: bf16[128,256], index: 2, kind: input, shape index: {}]   ;;  %s3459_s3 = inlined_call_operand.vmem [shape: f32[8,1024], index: 3, kind: input, shape index: {}]   ;;  %s3460_s4 = inlined_call_operand.vmem [shape: bf16[256,1024], index: 4, kind: input, shape index: {}]   ;;  %s3461_s5 = inlined_call_operand.vmem [shape: f32[32,128], index: 5, kind: output, shape index: {}]  }
   0x1   :  { %v2311_v0 = vld [vmem:[%s3460_s4] sm:$0xff]  ;;  %v2316_v1 = vld [vmem:[%s3460_s4 + $0x8] sm:$0xff]  ;;  %v2321_v2 = vld [vmem:[%s3460_s4 + $0x10] sm:$0xff] }
   0x2   :  { %3557 = vst [vmem:[#allocation7_spill] sm:$0xff] %v2321_v2  ;;  %v2326_v3 = vld [vmem:[%s3460_s4 + $0x18] sm:$0xff]  ;;  %v2331_v4 = vld [vmem:[%s3460_s4 + $0x20] sm:$0xff]  ;;  %v2336_v5 = vld [vmem:[%s3460_s4 + $0x28] sm:$0xff] }
   0x3   :  { %3558 = vst [vmem:[#allocation8_spill] sm:$0xff] %v2326_v3  ;;  %v2341_v6 = vld [vmem:[%s3460_s4 + $0x30] sm:$0xff]  ;;  %v2346_v7 = vld [vmem:[%s3460_s4 + $0x38] sm:$0xff]  ;;  %v2351_v8 = vld [vmem:[%s3460_s4 + $0x40] sm:$0xff] }
   0x4   :  { %3559 = vst [vmem:[#allocation9_spill] sm:$0xff] %v2341_v6  ;;  %3560 = vst [vmem:[#allocation10_spill] sm:$0xff] %v2346_v7  ;;  %v2356_v9 = vld [vmem:[%s3460_s4 + $0x48] sm:$0xff]  ;;  %v2361_v10 = vld [vmem:[%s3460_s4 + $0x50] sm:$0xff] }
   0x5   :  { %3561 = vst [vmem:[#allocation11_spill] sm:$0xff] %v2361_v10  ;;  %v2366_v11 = vld [vmem:[%s3460_s4 + $0x58] sm:$0xff]  ;;  %v2371_v12 = vld [vmem:[%s3460_s4 + $0x60] sm:$0xff]  ;;  %v2376_v13 = vld [vmem:[%s3460_s4 + $0x68] sm:$0xff] }
   0x6   :  { %3562 = vst [vmem:[#allocation12_spill] sm:$0xff] %v2366_v11  ;;  %v2381_v14 = vld [vmem:[%s3460_s4 + $0x70] sm:$0xff]  ;;  %v2386_v15 = vld [vmem:[%s3460_s4 + $0x78] sm:$0xff]  ;;  %v2391_v16 = vld [vmem:[%s3460_s4 + $0x80] sm:$0xff] }
   0x7   :  { %3563 = vst [vmem:[#allocation13_spill] sm:$0xff] %v2381_v14  ;;  %3564 = vst [vmem:[#allocation14_spill] sm:$0xff] %v2386_v15  ;;  %v2396_v17 = vld [vmem:[%s3460_s4 + $0x88] sm:$0xff]  ;;  %v2401_v18 = vld [vmem:[%s3460_s4 + $0x90] sm:$0xff] }
   0x8   :  { %3565 = vst [vmem:[#allocation15_spill] sm:$0xff] %v2401_v18  ;;  %v2406_v19 = vld [vmem:[%s3460_s4 + $0x98] sm:$0xff]  ;;  %v2411_v20 = vld [vmem:[%s3460_s4 + $0xa0] sm:$0xff]  ;;  %v2416_v21 = vld [vmem:[%s3460_s4 + $0xa8] sm:$0xff] }
   0x9   :  { %3566 = vst [vmem:[#allocation16_spill] sm:$0xff] %v2406_v19  ;;  %v2421_v22 = vld [vmem:[%s3460_s4 + $0xb0] sm:$0xff]  ;;  %v2426_v23 = vld [vmem:[%s3460_s4 + $0xb8] sm:$0xff]  ;;  %v2431_v24 = vld [vmem:[%s3460_s4 + $0xc0] sm:$0xff] }
   0xa   :  { %3567 = vst [vmem:[#allocation17_spill] sm:$0xff] %v2421_v22  ;;  %3568 = vst [vmem:[#allocation18_spill] sm:$0xff] %v2426_v23  ;;  %v2436_v25 = vld [vmem:[%s3460_s4 + $0xc8] sm:$0xff]  ;;  %v2441_v26 = vld [vmem:[%s3460_s4 + $0xd0] sm:$0xff] }
   0xb   :  { %3569 = vst [vmem:[#allocation19_spill] sm:$0xff] %v2441_v26  ;;  %v2446_v27 = vld [vmem:[%s3460_s4 + $0xd8] sm:$0xff]  ;;  %v2451_v28 = vld [vmem:[%s3460_s4 + $0xe0] sm:$0xff]  ;;  %v2456_v29 = vld [vmem:[%s3460_s4 + $0xe8] sm:$0xff] }
   0xc   :  { %3570 = vst [vmem:[#allocation20_spill] sm:$0xff] %v2446_v27  ;;  %v2461_v30 = vld [vmem:[%s3460_s4 + $0xf0] sm:$0xff]  ;;  %v2466_v31 = vld [vmem:[%s3460_s4 + $0xf8] sm:$0xff]  ;;  %v2471_v32 = vld [vmem:[%s3460_s4 + $0x100] sm:$0xff] }
   0xd   :  { %3571 = vst [vmem:[#allocation21_spill] sm:$0xff] %v2461_v30  ;;  %3572 = vst [vmem:[#allocation22_spill] sm:$0xff] %v2466_v31  ;;  %v2476_v33 = vld [vmem:[%s3460_s4 + $0x108] sm:$0xff]  ;;  %v2481_v34 = vld [vmem:[%s3460_s4 + $0x110] sm:$0xff] }
   0xe   :  { %3573 = vst [vmem:[#allocation23_spill] sm:$0xff] %v2481_v34  ;;  %v2486_v35 = vld [vmem:[%s3460_s4 + $0x118] sm:$0xff]  ;;  %v2491_v36 = vld [vmem:[%s3460_s4 + $0x120] sm:$0xff]  ;;  %v2496_v37 = vld [vmem:[%s3460_s4 + $0x128] sm:$0xff] }
   0xf   :  { %3574 = vst [vmem:[#allocation24_spill] sm:$0xff] %v2486_v35  ;;  %v2501_v38 = vld [vmem:[%s3460_s4 + $0x130] sm:$0xff]  ;;  %v2506_v39 = vld [vmem:[%s3460_s4 + $0x138] sm:$0xff]  ;;  %v2511_v40 = vld [vmem:[%s3460_s4 + $0x140] sm:$0xff] }
  0x10   :  { %3575 = vst [vmem:[#allocation25_spill] sm:$0xff] %v2501_v38  ;;  %3576 = vst [vmem:[#allocation26_spill] sm:$0xff] %v2506_v39  ;;  %v2516_v41 = vld [vmem:[%s3460_s4 + $0x148] sm:$0xff]  ;;  %v2521_v42 = vld [vmem:[%s3460_s4 + $0x150] sm:$0xff] }
  0x11   :  { %3577 = vst [vmem:[#allocation27_spill] sm:$0xff] %v2521_v42  ;;  %v2526_v43 = vld [vmem:[%s3460_s4 + $0x158] sm:$0xff]  ;;  %v2531_v44 = vld [vmem:[%s3460_s4 + $0x160] sm:$0xff]  ;;  %v2536_v45 = vld [vmem:[%s3460_s4 + $0x168] sm:$0xff] }
  0x12   :  { %3578 = vst [vmem:[#allocation28_spill] sm:$0xff] %v2526_v43  ;;  %v2541_v46 = vld [vmem:[%s3460_s4 + $0x170] sm:$0xff]  ;;  %v2546_v47 = vld [vmem:[%s3460_s4 + $0x178] sm:$0xff]  ;;  %v2551_v48 = vld [vmem:[%s3460_s4 + $0x180] sm:$0xff] }
  0x13   :  { %3579 = vst [vmem:[#allocation29_spill] sm:$0xff] %v2541_v46  ;;  %3580 = vst [vmem:[#allocation30_spill] sm:$0xff] %v2546_v47  ;;  %v2556_v49 = vld [vmem:[%s3460_s4 + $0x188] sm:$0xff]  ;;  %v2561_v50 = vld [vmem:[%s3460_s4 + $0x190] sm:$0xff] }
  0x14   :  { %3581 = vst [vmem:[#allocation31_spill] sm:$0xff] %v2561_v50  ;;  %v2566_v51 = vld [vmem:[%s3460_s4 + $0x198] sm:$0xff]  ;;  %v2571_v52 = vld [vmem:[%s3460_s4 + $0x1a0] sm:$0xff]  ;;  %v2576_v53 = vld [vmem:[%s3460_s4 + $0x1a8] sm:$0xff] }
  0x15   :  { %3582 = vst [vmem:[#allocation32_spill] sm:$0xff] %v2566_v51  ;;  %v2581_v54 = vld [vmem:[%s3460_s4 + $0x1b0] sm:$0xff]  ;;  %v2586_v55 = vld [vmem:[%s3460_s4 + $0x1b8] sm:$0xff]  ;;  %v2591_v56 = vld [vmem:[%s3460_s4 + $0x1c0] sm:$0xff] }
  0x16   :  { %3583 = vst [vmem:[#allocation33_spill] sm:$0xff] %v2581_v54  ;;  %3584 = vst [vmem:[#allocation34_spill] sm:$0xff] %v2586_v55  ;;  %v2596_v57 = vld [vmem:[%s3460_s4 + $0x1c8] sm:$0xff]  ;;  %v2601_v58 = vld [vmem:[%s3460_s4 + $0x1d0] sm:$0xff] }
  0x17   :  { %3585 = vst [vmem:[#allocation35_spill] sm:$0xff] %v2601_v58  ;;  %v2606_v59 = vld [vmem:[%s3460_s4 + $0x1d8] sm:$0xff]  ;;  %v2611_v60 = vld [vmem:[%s3460_s4 + $0x1e0] sm:$0xff]  ;;  %v2616_v61 = vld [vmem:[%s3460_s4 + $0x1e8] sm:$0xff] }
  0x18   :  { %3586 = vst [vmem:[#allocation36_spill] sm:$0xff] %v2606_v59  ;;  %v2621_v62 = vld [vmem:[%s3460_s4 + $0x1f0] sm:$0xff]  ;;  %v2626_v63 = vld [vmem:[%s3460_s4 + $0x1f8] sm:$0xff]  ;;  %v2631_v3 = vld [vmem:[%s3460_s4 + $0x200] sm:$0xff] }
  0x19   :  { %3587 = vst [vmem:[#allocation37_spill] sm:$0xff] %v2621_v62  ;;  %3588 = vst [vmem:[#allocation38_spill] sm:$0xff] %v2626_v63  ;;  %v2636_v7 = vld [vmem:[%s3460_s4 + $0x208] sm:$0xff]  ;;  %v2641_v2 = vld [vmem:[%s3460_s4 + $0x210] sm:$0xff] }
  0x1a   :  { %3589 = vst [vmem:[#allocation39_spill] sm:$0xff] %v2631_v3  ;;  %3590 = vst [vmem:[#allocation40_spill] sm:$0xff] %v2636_v7  ;;  %v2646_v6 = vld [vmem:[%s3460_s4 + $0x218] sm:$0xff]  ;;  %v2651_v11 = vld [vmem:[%s3460_s4 + $0x220] sm:$0xff] }
  0x1b   :  { %3591 = vst [vmem:[#allocation41_spill] sm:$0xff] %v2641_v2  ;;  %3592 = vst [vmem:[#allocation42_spill] sm:$0xff] %v2646_v6  ;;  %v2656_v15 = vld [vmem:[%s3460_s4 + $0x228] sm:$0xff]  ;;  %v2661_v10 = vld [vmem:[%s3460_s4 + $0x230] sm:$0xff] }
  0x1c   :  { %3593 = vst [vmem:[#allocation43_spill] sm:$0xff] %v2651_v11  ;;  %3594 = vst [vmem:[#allocation44_spill] sm:$0xff] %v2656_v15  ;;  %v2666_v2 = vld [vmem:[%s3460_s4 + $0x238] sm:$0xff]  ;;  %v2671_v6 = vld [vmem:[%s3460_s4 + $0x240] sm:$0xff] }
  0x1d   :  { %3595 = vst [vmem:[#allocation45_spill] sm:$0xff] %v2661_v10  ;;  %3596 = vst [vmem:[#allocation46_spill] sm:$0xff] %v2666_v2  ;;  %v2676_v14 = vld [vmem:[%s3460_s4 + $0x248] sm:$0xff]  ;;  %v2681_v19 = vld [vmem:[%s3460_s4 + $0x250] sm:$0xff] }
  0x1e   :  { %3597 = vst [vmem:[#allocation47_spill] sm:$0xff] %v2671_v6  ;;  %3598 = vst [vmem:[#allocation48_spill] sm:$0xff] %v2676_v14  ;;  %v2686_v10 = vld [vmem:[%s3460_s4 + $0x258] sm:$0xff]  ;;  %v2691_v2 = vld [vmem:[%s3460_s4 + $0x260] sm:$0xff] }
  0x1f   :  { %3599 = vst [vmem:[#allocation49_spill] sm:$0xff] %v2681_v19  ;;  %3600 = vst [vmem:[#allocation50_spill] sm:$0xff] %v2686_v10  ;;  %v2696_v23 = vld [vmem:[%s3460_s4 + $0x268] sm:$0xff]  ;;  %v2701_v18 = vld [vmem:[%s3460_s4 + $0x270] sm:$0xff] }
  0x20   :  { %3601 = vst [vmem:[#allocation51_spill] sm:$0xff] %v2691_v2  ;;  %3602 = vst [vmem:[#allocation52_spill] sm:$0xff] %v2696_v23  ;;  %v2706_v19 = vld [vmem:[%s3460_s4 + $0x278] sm:$0xff]  ;;  %v2711_v10 = vld [vmem:[%s3460_s4 + $0x280] sm:$0xff] }
  0x21   :  { %3603 = vst [vmem:[#allocation53_spill] sm:$0xff] %v2701_v18  ;;  %3604 = vst [vmem:[#allocation54_spill] sm:$0xff] %v2706_v19  ;;  %v2716_v22 = vld [vmem:[%s3460_s4 + $0x288] sm:$0xff]  ;;  %v2721_v27 = vld [vmem:[%s3460_s4 + $0x290] sm:$0xff] }
  0x22   :  { %3605 = vst [vmem:[#allocation55_spill] sm:$0xff] %v2711_v10  ;;  %3606 = vst [vmem:[#allocation56_spill] sm:$0xff] %v2716_v22  ;;  %v2726_v18 = vld [vmem:[%s3460_s4 + $0x298] sm:$0xff]  ;;  %v2731_v19 = vld [vmem:[%s3460_s4 + $0x2a0] sm:$0xff] }
  0x23   :  { %3607 = vst [vmem:[#allocation57_spill] sm:$0xff] %v2721_v27  ;;  %3608 = vst [vmem:[#allocation58_spill] sm:$0xff] %v2726_v18  ;;  %v2736_v31 = vld [vmem:[%s3460_s4 + $0x2a8] sm:$0xff]  ;;  %v2741_v26 = vld [vmem:[%s3460_s4 + $0x2b0] sm:$0xff] }
  0x24   :  { %3609 = vst [vmem:[#allocation59_spill] sm:$0xff] %v2731_v19  ;;  %3610 = vst [vmem:[#allocation60_spill] sm:$0xff] %v2736_v31  ;;  %v2746_v27 = vld [vmem:[%s3460_s4 + $0x2b8] sm:$0xff]  ;;  %v2751_v18 = vld [vmem:[%s3460_s4 + $0x2c0] sm:$0xff] }
  0x25   :  { %3611 = vst [vmem:[#allocation61_spill] sm:$0xff] %v2741_v26  ;;  %3612 = vst [vmem:[#allocation62_spill] sm:$0xff] %v2746_v27  ;;  %v2756_v30 = vld [vmem:[%s3460_s4 + $0x2c8] sm:$0xff]  ;;  %v2761_v35 = vld [vmem:[%s3460_s4 + $0x2d0] sm:$0xff] }
  0x26   :  { %3613 = vst [vmem:[#allocation63_spill] sm:$0xff] %v2751_v18  ;;  %3614 = vst [vmem:[#allocation64_spill] sm:$0xff] %v2756_v30  ;;  %v2766_v26 = vld [vmem:[%s3460_s4 + $0x2d8] sm:$0xff]  ;;  %v2771_v27 = vld [vmem:[%s3460_s4 + $0x2e0] sm:$0xff] }
  0x27   :  { %3615 = vst [vmem:[#allocation65_spill] sm:$0xff] %v2761_v35  ;;  %3616 = vst [vmem:[#allocation66_spill] sm:$0xff] %v2766_v26  ;;  %v2776_v39 = vld [vmem:[%s3460_s4 + $0x2e8] sm:$0xff]  ;;  %v2781_v34 = vld [vmem:[%s3460_s4 + $0x2f0] sm:$0xff] }
  0x28   :  { %3617 = vst [vmem:[#allocation67_spill] sm:$0xff] %v2771_v27  ;;  %3618 = vst [vmem:[#allocation68_spill] sm:$0xff] %v2776_v39  ;;  %v2786_v35 = vld [vmem:[%s3460_s4 + $0x2f8] sm:$0xff]  ;;  %v2791_v26 = vld [vmem:[%s3460_s4 + $0x300] sm:$0xff] }
  0x29   :  { %3619 = vst [vmem:[#allocation69_spill] sm:$0xff] %v2781_v34  ;;  %3620 = vst [vmem:[#allocation70_spill] sm:$0xff] %v2786_v35  ;;  %v2796_v38 = vld [vmem:[%s3460_s4 + $0x308] sm:$0xff]  ;;  %v2801_v43 = vld [vmem:[%s3460_s4 + $0x310] sm:$0xff] }
  0x2a   :  { %3621 = vst [vmem:[#allocation71_spill] sm:$0xff] %v2791_v26  ;;  %3622 = vst [vmem:[#allocation72_spill] sm:$0xff] %v2796_v38  ;;  %v2806_v34 = vld [vmem:[%s3460_s4 + $0x318] sm:$0xff]  ;;  %v2811_v35 = vld [vmem:[%s3460_s4 + $0x320] sm:$0xff] }
  0x2b   :  { %3623 = vst [vmem:[#allocation73_spill] sm:$0xff] %v2801_v43  ;;  %3624 = vst [vmem:[#allocation74_spill] sm:$0xff] %v2806_v34  ;;  %v2816_v47 = vld [vmem:[%s3460_s4 + $0x328] sm:$0xff]  ;;  %v2821_v42 = vld [vmem:[%s3460_s4 + $0x330] sm:$0xff] }
  0x2c   :  { %3625 = vst [vmem:[#allocation75_spill] sm:$0xff] %v2811_v35  ;;  %3626 = vst [vmem:[#allocation76_spill] sm:$0xff] %v2816_v47  ;;  %v2826_v43 = vld [vmem:[%s3460_s4 + $0x338] sm:$0xff]  ;;  %v2831_v34 = vld [vmem:[%s3460_s4 + $0x340] sm:$0xff] }
  0x2d   :  { %3627 = vst [vmem:[#allocation77_spill] sm:$0xff] %v2821_v42  ;;  %3628 = vst [vmem:[#allocation78_spill] sm:$0xff] %v2826_v43  ;;  %v2836_v46 = vld [vmem:[%s3460_s4 + $0x348] sm:$0xff]  ;;  %v2841_v51 = vld [vmem:[%s3460_s4 + $0x350] sm:$0xff] }
  0x2e   :  { %3629 = vst [vmem:[#allocation79_spill] sm:$0xff] %v2831_v34  ;;  %3630 = vst [vmem:[#allocation80_spill] sm:$0xff] %v2836_v46  ;;  %v2846_v42 = vld [vmem:[%s3460_s4 + $0x358] sm:$0xff]  ;;  %v2851_v43 = vld [vmem:[%s3460_s4 + $0x360] sm:$0xff] }
  0x2f   :  { %3631 = vst [vmem:[#allocation81_spill] sm:$0xff] %v2841_v51  ;;  %3632 = vst [vmem:[#allocation82_spill] sm:$0xff] %v2846_v42  ;;  %v2856_v55 = vld [vmem:[%s3460_s4 + $0x368] sm:$0xff]  ;;  %v2861_v50 = vld [vmem:[%s3460_s4 + $0x370] sm:$0xff] }
  0x30   :  { %3633 = vst [vmem:[#allocation83_spill] sm:$0xff] %v2851_v43  ;;  %3634 = vst [vmem:[#allocation84_spill] sm:$0xff] %v2856_v55  ;;  %v2866_v51 = vld [vmem:[%s3460_s4 + $0x378] sm:$0xff]  ;;  %v2871_v42 = vld [vmem:[%s3460_s4 + $0x380] sm:$0xff] }
  0x31   :  { %3635 = vst [vmem:[#allocation85_spill] sm:$0xff] %v2861_v50  ;;  %3636 = vst [vmem:[#allocation86_spill] sm:$0xff] %v2866_v51  ;;  %v2876_v54 = vld [vmem:[%s3460_s4 + $0x388] sm:$0xff]  ;;  %v2881_v59 = vld [vmem:[%s3460_s4 + $0x390] sm:$0xff] }
  0x32   :  { %3637 = vst [vmem:[#allocation87_spill] sm:$0xff] %v2881_v59  ;;  %v2886_v50 = vld [vmem:[%s3460_s4 + $0x398] sm:$0xff]  ;;  %v2891_v51 = vld [vmem:[%s3460_s4 + $0x3a0] sm:$0xff]  ;;  %v2896_v63 = vld [vmem:[%s3460_s4 + $0x3a8] sm:$0xff] }
  0x33   :  { %3638 = vst [vmem:[#allocation88_spill] sm:$0xff] %v2886_v50  ;;  %v2901_v58 = vld [vmem:[%s3460_s4 + $0x3b0] sm:$0xff]  ;;  %v2906_v59 = vld [vmem:[%s3460_s4 + $0x3b8] sm:$0xff]  ;;  %v2911_v50 = vld [vmem:[%s3460_s4 + $0x3c0] sm:$0xff] }
  0x34   :  { %3639 = vst [vmem:[#allocation89_spill] sm:$0xff] %v2901_v58  ;;  %3640 = vst [vmem:[#allocation90_spill] sm:$0xff] %v2906_v59  ;;  %v2916_v62 = vld [vmem:[%s3460_s4 + $0x3c8] sm:$0xff]  ;;  %v2921_v7 = vld [vmem:[%s3460_s4 + $0x3d0] sm:$0xff] }
  0x35   :  { %3641 = vst [vmem:[#allocation91_spill] sm:$0xff] %v2921_v7  ;;  %v2926_v58 = vld [vmem:[%s3460_s4 + $0x3d8] sm:$0xff]  ;;  %v2931_v59 = vld [vmem:[%s3460_s4 + $0x3e0] sm:$0xff]  ;;  %v2936_v15 = vld [vmem:[%s3460_s4 + $0x3e8] sm:$0xff] }
  0x36   :  { %3642 = vst [vmem:[#allocation92_spill] sm:$0xff] %v2926_v58  ;;  %v2941_v3 = vld [vmem:[%s3460_s4 + $0x3f0] sm:$0xff]  ;;  %v2946_v7 = vld [vmem:[%s3460_s4 + $0x3f8] sm:$0xff] }
  0x37   :  { %3643 = vst [vmem:[#allocation93_spill] sm:$0xff] %v2941_v3  ;;  %3644 = vst [vmem:[#allocation94_spill] sm:$0xff] %v2946_v7 }
  0x38   :  { %315 = vsyncadd [#allocation4], 16384  ;;  %v322_v58 = vld [vmem:[%s3457_s1 + $0x8] sm:$0xf]  ;;  %v323_v11 = vld [vmem:[%s3457_s1 + $0xc] sm:$0xf] }
  0x39   :  { %v2957_v14 = vld [vmem:[%s3459_s3 + $0x8] sm:$0xff]  ;;  %v2962_v3 = vld [vmem:[%s3459_s3 + $0x10] sm:$0xff]  ;;  %v2967_v7 = vld [vmem:[%s3459_s3 + $0x18] sm:$0xff]  ;;  %v1980_v23 = vcombine.low %v322_v58, %v323_v11  ;;  %709 = vst [vmem:[#allocation3 + $0x10] sm:$0xf] %v322_v58  ;;  %vm386_vm0 = vcmask 261120  }
  0x3a   :  { %3645 = vst [vmem:[#allocation95_spill] sm:$0xff] %v2957_v14  ;;  %3646 = vst [vmem:[#allocation96_spill] sm:$0xff] %v2962_v3  ;;  %v2972_v6 = vld [vmem:[%s3459_s3 + $0x20] sm:$0xff]  ;;  %v2977_v14 = vld [vmem:[%s3459_s3 + $0x28] sm:$0xff] }
  0x3b   :  { %3647 = vst [vmem:[#allocation97_spill] sm:$0xff] %v2967_v7  ;;  %710 = vst [vmem:[#allocation3 + $0x18] sm:$0xf] %v323_v11  ;;  %v2982_v3 = vld [vmem:[%s3459_s3 + $0x30] sm:$0xff]  ;;  %v2987_v58 = vld [vmem:[%s3459_s3 + $0x38] sm:$0xff]  ;;  %2174 = vmatprep.subr.bf16.mxu0 %v1980_v23 }
  0x3c   :  { %3648 = vst [vmem:[#allocation98_spill] sm:$0xff] %v2972_v6  ;;  %3649 = vst [vmem:[#allocation99_spill] sm:$0xff] %v2977_v14  ;;  %v320_v11 = vld [vmem:[%s3457_s1] sm:$0xf]  ;;  %v321_v6 = vld [vmem:[%s3457_s1 + $0x4] sm:$0xf]  ;;  %2175 = vmatpush3.bf16.msra.mxu0 %v1980_v23 }
  0x3d   :  { %3650 = vst [vmem:[#allocation100_spill] sm:$0xff] %v2982_v3  ;;  %3651 = vst [vmem:[#allocation101_spill] sm:$0xff] %v2987_v58  ;;  %v1979_v14 = vcombine.low %v320_v11, %v321_v6  ;;  %v2233_v3 = vld [vmem:[%s3456_s0] sm:$0xff]   ;;  %v3001_v58 = vld [vmem:[%s3456_s0 + $0x8] sm:$0xff]  }
  0x3e   :  { %707 = vst [vmem:[#allocation3] sm:$0xf] %v320_v11  ;;  %708 = vst [vmem:[#allocation3 + $0x8] sm:$0xf] %v321_v6  ;;  %2178 = vmatprep.mubr.msk.bf16.mxu0 %vm386_vm0, %v2233_v3  ;;  %v2235_v7 = vld [vmem:[%s3458_s2 + $0x70] ss:$8 sps:$4 sm:$0xff]  }
  0x3f   :  { %2176 = vmatprep.subr.bf16.mxu0 %v1979_v14  ;;  %v2236_v6 = vld [vmem:[%s3458_s2 + $0x60] ss:$8 sps:$4 sm:$0xff]   ;;  %2182 = vmatprep.subr.bf16.mxu1 %v2235_v7  ;;  %v2237_v23 = vld [vmem:[%s3458_s2 + $0x50] ss:$8 sps:$4 sm:$0xff]  }
  0x40   :  { %2177 = vmatpush3.bf16.msra.mxu0 %v1979_v14  ;;  %2183 = vmatpush3.bf16.msra.mxu1 %v2235_v7  ;;  %v2238_v11 = vld [vmem:[%s3458_s2 + $0x40] ss:$8 sps:$4 sm:$0xff]   ;;  %v2239_v7 = vld [vmem:[%s3458_s2 + $0x30] ss:$8 sps:$4 sm:$0xff]  }
  0x41   :  { %2184 = vmatprep.subr.bf16.mxu1 %v2236_v6  ;;  %v2240_v14 = vld [vmem:[%s3458_s2 + $0x20] ss:$8 sps:$4 sm:$0xff]  }
  0x43   :  { %2179 = vmatmul.mubr.msk.bf16.vlgmr.msra.gmra.mxu0 %vm386_vm0, %v3001_v58 }
  0x44   :  { %2185 = vmatpush3.bf16.msra.mxu1 %v2236_v6  ;;  %v2241_v6 = vld [vmem:[%s3458_s2 + $0x10] ss:$8 sps:$4 sm:$0xff]  }
  0x45   :  { %2186 = vmatprep.subr.bf16.mxu1 %v2237_v23 }
  0x48   :  { %2187 = vmatpush3.bf16.msra.mxu1 %v2237_v23  ;;  %v2242_v23 = vld [vmem:[%s3458_s2] ss:$8 sps:$4 sm:$0xff]  }
  0x49   :  { %2188 = vmatprep.subr.bf16.mxu1 %v2238_v11 }
  0x4c   :  { %2189 = vmatpush3.bf16.msra.mxu1 %v2238_v11  ;;  %v2243_v11 = vld [vmem:[%s3458_s2 + $0x74] ss:$8 sps:$4 sm:$0xff]  }
  0x4d   :  { %2190 = vmatprep.subr.bf16.mxu1 %v2239_v7  ;;  %2202 = vmatprep.subr.bf16.mxu0 %v2243_v11 }
  0x4e   :  { %2203 = vmatpush3.bf16.msra.mxu0 %v2243_v11 }
  0x50   :  { %2191 = vmatpush3.bf16.msra.mxu1 %v2239_v7  ;;  %v2244_v7 = vld [vmem:[%s3458_s2 + $0x64] ss:$8 sps:$4 sm:$0xff]  }
  0x51   :  { %2192 = vmatprep.subr.bf16.mxu1 %v2240_v14  ;;  %2204 = vmatprep.subr.bf16.mxu0 %v2244_v7 }
  0x52   :  { %2205 = vmatpush3.bf16.msra.mxu0 %v2244_v7 }
  0x54   :  { %2193 = vmatpush3.bf16.msra.mxu1 %v2240_v14  ;;  %v2245_v14 = vld [vmem:[%s3458_s2 + $0x54] ss:$8 sps:$4 sm:$0xff]  }
  0x55   :  { %2194 = vmatprep.subr.bf16.mxu1 %v2241_v6  ;;  %2206 = vmatprep.subr.bf16.mxu0 %v2245_v14 }
  0x56   :  { %2207 = vmatpush3.bf16.msra.mxu0 %v2245_v14  ;;  %v2248_v14 = vld [vmem:[%s3458_s2 + $0x24] ss:$8 sps:$4 sm:$0xff]  }
  0x58   :  { %2195 = vmatpush3.bf16.msra.mxu1 %v2241_v6  ;;  %v2246_v6 = vld [vmem:[%s3458_s2 + $0x44] ss:$8 sps:$4 sm:$0xff]  }
  0x59   :  { %2196 = vmatprep.subr.bf16.mxu1 %v2242_v23  ;;  %2208 = vmatprep.subr.bf16.mxu0 %v2246_v6 }
  0x5a   :  { %2209 = vmatpush3.bf16.msra.mxu0 %v2246_v6  ;;  %v2249_v6 = vld [vmem:[%s3458_s2 + $0x14] ss:$8 sps:$4 sm:$0xff]  }
  0x5c   :  { %2197 = vmatpush3.bf16.msra.mxu1 %v2242_v23  ;;  %v2247_v23 = vld [vmem:[%s3458_s2 + $0x34] ss:$8 sps:$4 sm:$0xff]  }
  0x5d   :  { %2210 = vmatprep.subr.bf16.mxu0 %v2247_v23 }
  0x5e   :  { %2211 = vmatpush3.bf16.msra.mxu0 %v2247_v23 }
  0x5f   :  { %2212 = vmatprep.subr.bf16.mxu0 %v2248_v14 }
  0x62   :  { %2213 = vmatpush3.bf16.msra.mxu0 %v2248_v14 }
  0x63   :  { %2214 = vmatprep.subr.bf16.mxu0 %v2249_v6 }
  0x66   :  { %2215 = vmatpush3.bf16.msra.mxu0 %v2249_v6 }
 0x103   :  { %v2180_v11 = vpop.f32.mrf.mxu0 }
 0x105   :  { %v427_v2 = vpop.f32.mrf.mxu0 }
 0x107   :  { %v2181_v22 = vpop.f32.mrf.mxu0 }
 0x108   :  { %v443_v7 = vpack.c.bf16 %v2181_v22, %v2180_v11 }
 0x109   :  { %v430_v31 = vpop.f32.mrf.mxu0 }
 0x10a   :  { %v442_v10 = vpack.c.bf16 %v430_v31, %v427_v2  ;;  %v2250_v2 = vld [vmem:[%s3458_s2 + $0x4] ss:$8 sps:$4 sm:$0xff]  }
 0x10b   :  { %2216 = vmatprep.subr.bf16.mxu0 %v2250_v2  ;;  %v3061_v31 = vld [vmem:[%s3459_s3] sm:$0xff] }
 0x10c   :  { %2198 = vmatprep.mubr.bf16.mxu1 %v442_v10  ;;  %2217 = vmatpush3.bf16.msra.mxu0 %v2250_v2  ;;  %v444_v10 = vlaneseq }
 0x10d   :  { %2199 = vmatmul.mubr.bf16.vlgmr.msra.gmra.mxu1 %v443_v7 }
 0x10e   :  { %2226 = vmatprep.mubr.msk.bf16.mxu1 %vm386_vm0, %v2233_v3  ;;  %v3055_v3 = vshrl.u32 %v444_v10, 7 }
 0x110   :  { %v446_v22 = vsub.s32 0, %v3055_v3 }
 0x112   :  { %v447_v11 = vrot.slane %v3061_v31, %v446_v22 }
 0x1cd   :  { %v2200_v23 = vpop.f32.mrf.mxu1 }
 0x1ce   :  { %v539_v30 = vadd.f32 %v2200_v23, %v447_v11 }
 0x1cf   :  { %v530_v7 = vpop.f32.mrf.mxu1 }
 0x1d0   :  { %v531_v6 = vadd.f32 %v530_v7, %v447_v11  ;;  %v547_v38 = vmax.f32 %v539_v30, 0.0 }
 0x1d1   :  { %v2201_v14 = vpop.f32.mrf.mxu1 }
 0x1d2   :  { %v542_v19 = vadd.f32 %v2201_v14, %v447_v11  ;;  %v545_v10 = vmax.f32 %v531_v6, 0.0  ;;  %v2066_v6 = vcombine.high %v2591_v56, %v2611_v60 }
 0x1d3   :  { %v533_v39 = vpop.f32.mrf.mxu1 }
 0x1d4   :  { %v534_v2 = vadd.f32 %v533_v39, %v447_v11  ;;  %v548_v18 = vmax.f32 %v542_v19, 0.0  ;;  %v652_v19 = vsub.s32 1, %v3055_v3 }
 0x1d6   :  { %v546_v27 = vmax.f32 %v534_v2, 0.0  ;;  %v550_v26 = vpack.c.bf16 %v548_v18, %v547_v38  ;;  %v2068_v2 = vcombine.high %v2596_v57, %v2616_v61 }
 0x1d8   :  { %v549_v47 = vpack.c.bf16 %v546_v27, %v545_v10  ;;  %v653_v27 = vrot.slane %v3061_v31, %v652_v19  ;;  %v2065_v10 = vcombine.low %v2591_v56, %v2611_v60 }
 0x1da   :  { %2218 = vmatprep.mubr.bf16.mxu0 %v549_v47 }
 0x1db   :  { %2219 = vmatmul.mubr.bf16.vlgmr.msra.gmra.mxu0 %v550_v26 }
 0x29b   :  { %v2220_v35 = vpop.f32.mrf.mxu0 }
 0x29d   :  { %v633_v46 = vpop.f32.mrf.mxu0 }
 0x29f   :  { %v2221_v55 = vpop.f32.mrf.mxu0 }
 0x2a0   :  { %v649_v34 = vpack.c.bf16 %v2221_v55, %v2220_v35 }
 0x2a1   :  { %v636_v22 = vpop.f32.mrf.mxu0 }
 0x2a2   :  { %v648_v43 = vpack.c.bf16 %v636_v22, %v633_v46  ;;  %2222 = vmatprep.subr.bf16.mxu1 %v649_v34  ;;  %v2067_v22 = vcombine.low %v2596_v57, %v2616_v61 }
 0x2a3   :  { %2223 = vmatpush3.bf16.msra.mxu1 %v649_v34 }
 0x2a4   :  { %2224 = vmatprep.subr.bf16.mxu1 %v648_v43 }
 0x2a7   :  { %2225 = vmatpush3.bf16.msra.mxu1 %v648_v43 }
 0x2aa   :  { %2227 = vmatmul.mubr.msk.bf16.vlgmr.msra.gmra.mxu1 %vm386_vm0, %v3001_v58 }
 0x36a   :  { %v2228_v18 = vpop.f32.mrf.mxu1 }
 0x36b   :  { %v697_v30 = vadd.f32 %v2228_v18, %v653_v27 }
 0x36c   :  { %v688_v26 = vpop.f32.mrf.mxu1 }
 0x36d   :  { %v705_v38 = vmax.f32 %v697_v30, 0.0  ;;  %v689_v39 = vadd.f32 %v688_v26, %v653_v27 }
 0x36e   :  { %v2229_v47 = vpop.f32.mrf.mxu1 }
 0x36f   :  { %v2144_v35 = vpack.c.bf16 %v705_v38, %v705_v38  ;;  %v703_v55 = vmax.f32 %v689_v39, 0.0  ;;  %v700_v46 = vadd.f32 %v2229_v47, %v653_v27 }
 0x370   :  { %v691_v23 = vpop.f32.mrf.mxu1 }
 0x371   :  { %729 = vst [vmem:[#allocation3 + $0x14] sm:$0xf] %v2144_v35  ;;  %v2142_v34 = vpack.c.bf16 %v703_v55, %v703_v55  ;;  %v706_v43 = vmax.f32 %v700_v46, 0.0  ;;  %v692_v11 = vadd.f32 %v691_v23, %v653_v27 }
 0x373   :  { %727 = vst [vmem:[#allocation3 + $0x4] sm:$0xf] %v2142_v34  ;;  %v2145_v58 = vpack.c.bf16 %v706_v43, %v706_v43  ;;  %v704_v7 = vmax.f32 %v692_v11, 0.0 }
 0x375   :  { %730 = vst [vmem:[#allocation3 + $0x1c] sm:$0xf] %v2145_v58  ;;  %v2143_v14 = vpack.c.bf16 %v704_v7, %v704_v7 }
 0x377   :  { %728 = vst [vmem:[#allocation3 + $0xc] sm:$0xf] %v2143_v14 }
 0x378   :  { %2275 = dma.done.wait [#allocation4], 16384 }
 0x379   :  { %2276 = vsyncadd [#allocation4], 4294950912  ;;  %v2058_v19 = vcombine.high %v2551_v48, %v2571_v52  ;;  %v2060_v27 = vcombine.high %v2556_v49, %v2576_v53  ;;  %1559 = vmatprep.subr.bf16.mxu0 %v2066_v6  ;;  %1612 = vmatprep.subr.bf16.mxu1 %v2068_v2  ;;  %v2057_v18 = vcombine.low %v2551_v48, %v2571_v52  ;;  %v3655_v38 = vld [vmem:[#allocation80_spill] sm:$0xff]  ;;  %v3660_v43 = vld [vmem:[#allocation67_spill] sm:$0xff] }
 0x37a   :  { %1560 = vmatpush1.bf16.msra.mxu0 %v2065_v10  ;;  %1613 = vmatpush1.bf16.msra.mxu1 %v2067_v22  ;;  %v2059_v56 = vcombine.low %v2556_v49, %v2576_v53  ;;  %v2050_v57 = vcombine.high %v2511_v40, %v2531_v44  ;;  %v2052_v60 = vcombine.high %v2516_v41, %v2536_v45  ;;  %v3659_v55 = vld [vmem:[#allocation72_spill] sm:$0xff]  ;;  %v3661_v11 = vld [vmem:[#allocation63_spill] sm:$0xff] }
 0x37b   :  { %1561 = vmatprep.subr.bf16.mxu0 %v2058_v19  ;;  %1614 = vmatprep.subr.bf16.mxu1 %v2060_v27  ;;  %v2049_v61 = vcombine.low %v2511_v40, %v2531_v44  ;;  %v2051_v30 = vcombine.low %v2516_v41, %v2536_v45  ;;  %v2042_v49 = vcombine.high %v2471_v32, %v2491_v36  ;;  %v3662_v7 = vld [vmem:[#allocation68_spill] sm:$0xff]  ;;  %v3664_v22 = vld [vmem:[#allocation59_spill] sm:$0xff] }
 0x37c   :  { %v2044_v52 = vcombine.high %v2476_v33, %v2496_v37  ;;  %v2041_v40 = vcombine.low %v2471_v32, %v2491_v36  ;;  %v2043_v41 = vcombine.low %v2476_v33, %v2496_v37  ;;  %v2034_v44 = vcombine.high %v2431_v24, %v2451_v28  ;;  %v3663_v14 = vld [vmem:[#allocation64_spill] sm:$0xff]  ;;  %v3665_v19 = vld [vmem:[#allocation55_spill] sm:$0xff] }
 0x37d   :  { %v2036_v45 = vcombine.high %v2436_v25, %v2456_v29  ;;  %v2033_v53 = vcombine.low %v2431_v24, %v2451_v28  ;;  %v2035_v26 = vcombine.low %v2436_v25, %v2456_v29  ;;  %v2026_v32 = vcombine.high %v2391_v16, %v2411_v20 }
 0x37e   :  { %1562 = vmatpush1.bf16.msra.mxu0 %v2057_v18  ;;  %1615 = vmatpush1.bf16.msra.mxu1 %v2059_v56  ;;  %v3092_v48 = vld [vmem:[#allocation3 + $0x4] ss:$8 sps:$4 sm:$0xff]   ;;  %v2028_v33 = vcombine.high %v2396_v17, %v2416_v21  ;;  %v2025_v36 = vcombine.low %v2391_v16, %v2411_v20  ;;  %v2027_v37 = vcombine.low %v2396_v17, %v2416_v21 }
 0x37f   :  { %1563 = vmatprep.subr.bf16.mxu0 %v2050_v57  ;;  %1616 = vmatprep.subr.bf16.mxu1 %v2052_v60  ;;  %v2018_v24 = vcombine.high %v2351_v8, %v2371_v12  ;;  %v2020_v25 = vcombine.high %v2356_v9, %v2376_v13  ;;  %v2017_v28 = vcombine.low %v2351_v8, %v2371_v12  ;;  %v3666_v18 = vld [vmem:[#allocation60_spill] sm:$0xff] }
 0x380   :  { %1591 = vmatprep.mubr.bf16.mxu0 %v3092_v48  ;;  %1644 = vmatprep.mubr.bf16.mxu1 %v3092_v48  ;;  %v2019_v29 = vcombine.low %v2356_v9, %v2376_v13  ;;  %v2010_v16 = vcombine.high %v2311_v0, %v2331_v4  ;;  %v2012_v17 = vcombine.high %v2316_v1, %v2336_v5  ;;  %v3667_v56 = vld [vmem:[#allocation56_spill] sm:$0xff] }
 0x381   :  { %v2009_v20 = vcombine.low %v2311_v0, %v2331_v4  ;;  %v2011_v21 = vcombine.low %v2316_v1, %v2336_v5  ;;  %v2130_v8 = vcombine.high %v2911_v50, %v2931_v59  ;;  %v2132_v9 = vcombine.high %v2916_v62, %v2936_v15 }
 0x382   :  { %1564 = vmatpush1.bf16.msra.mxu0 %v2049_v61  ;;  %1617 = vmatpush1.bf16.msra.mxu1 %v2051_v30  ;;  %v2129_v12 = vcombine.low %v2911_v50, %v2931_v59  ;;  %v2131_v13 = vcombine.low %v2916_v62, %v2936_v15  ;;  %v2122_v0 = vcombine.high %v2871_v42, %v2891_v51  ;;  %v3652_v50 = vld [vmem:[#allocation83_spill] sm:$0xff]  ;;  %v3654_v62 = vld [vmem:[#allocation84_spill] sm:$0xff] }
 0x383   :  { %1565 = vmatprep.subr.bf16.mxu0 %v2042_v49  ;;  %1618 = vmatprep.subr.bf16.mxu1 %v2044_v52  ;;  %v2124_v1 = vcombine.high %v2876_v54, %v2896_v63  ;;  %v2121_v4 = vcombine.low %v2871_v42, %v2891_v51  ;;  %v2123_v5 = vcombine.low %v2876_v54, %v2896_v63  ;;  %v3653_v15 = vld [vmem:[#allocation79_spill] sm:$0xff]  ;;  %v3658_v63 = vld [vmem:[#allocation76_spill] sm:$0xff] }
 0x384   :  { %v2114_v59 = vcombine.high %v3653_v15, %v3652_v50  ;;  %v2116_v39 = vcombine.high %v3655_v38, %v3654_v62  ;;  %v2113_v47 = vcombine.low %v3653_v15, %v3652_v50  ;;  %v2115_v35 = vcombine.low %v3655_v38, %v3654_v62  ;;  %v3656_v42 = vld [vmem:[#allocation75_spill] sm:$0xff]  ;;  %v3683_v50 = vld [vmem:[#allocation32_spill] sm:$0xff] }
 0x385   :  { %v3657_v51 = vld [vmem:[#allocation71_spill] sm:$0xff]  ;;  %v2108_v46 = vcombine.high %v3659_v55, %v3658_v63  ;;  %v2107_v34 = vcombine.low %v3659_v55, %v3658_v63  ;;  %v2098_v58 = vcombine.high %v3661_v11, %v3660_v43  ;;  %v2100_v6 = vcombine.high %v3663_v14, %v3662_v7  ;;  %v3228_v63 = vld [vmem:[#allocation3 + $0x10] ss:$8 sps:$4 sm:$0xff]  }
 0x386   :  { %1566 = vmatpush1.bf16.msra.mxu0 %v2041_v40  ;;  %1619 = vmatpush1.bf16.msra.mxu1 %v2043_v41  ;;  %v2106_v54 = vcombine.high %v3657_v51, %v3656_v42  ;;  %v2105_v23 = vcombine.low %v3657_v51, %v3656_v42  ;;  %v2097_v2 = vcombine.low %v3661_v11, %v3660_v43  ;;  %v3668_v30 = vld [vmem:[#allocation51_spill] sm:$0xff]  ;;  %v3670_v40 = vld [vmem:[#allocation52_spill] sm:$0xff]  ;;  %v3686_v42 = vld [vmem:[#allocation30_spill] sm:$0xff] }
 0x387   :  { %1567 = vmatprep.subr.bf16.mxu0 %v2034_v44  ;;  %1620 = vmatprep.subr.bf16.mxu1 %v2036_v45  ;;  %v2099_v10 = vcombine.low %v3663_v14, %v3662_v7  ;;  %v2090_v27 = vcombine.high %v3665_v19, %v3664_v22  ;;  %v2092_v57 = vcombine.high %v3667_v56, %v3666_v18  ;;  %v3669_v49 = vld [vmem:[#allocation47_spill] sm:$0xff]  ;;  %v3671_v41 = vld [vmem:[#allocation48_spill] sm:$0xff]  ;;  %v3690_v11 = vld [vmem:[#allocation26_spill] sm:$0xff] }
 0x388   :  { %v2089_v60 = vcombine.low %v3665_v19, %v3664_v22  ;;  %v2091_v61 = vcombine.low %v3667_v56, %v3666_v18  ;;  %v2082_v52 = vcombine.high %v3669_v49, %v3668_v30  ;;  %v2084_v44 = vcombine.high %v3671_v41, %v3670_v40  ;;  %v3687_v51 = vld [vmem:[#allocation28_spill] sm:$0xff]  ;;  %v3694_v19 = vld [vmem:[#allocation22_spill] sm:$0xff] }
 0x389   :  { %v2081_v45 = vcombine.low %v3669_v49, %v3668_v30  ;;  %v3698_v49 = vld [vmem:[#allocation18_spill] sm:$0xff] }
 0x38a   :  { %1568 = vmatpush1.bf16.msra.mxu0 %v2033_v53  ;;  %1621 = vmatpush1.bf16.msra.mxu1 %v2035_v26  ;;  %v2083_v53 = vcombine.low %v3671_v41, %v3670_v40  ;;  %v3672_v26 = vld [vmem:[#allocation43_spill] sm:$0xff] }
 0x38b   :  { %1569 = vmatprep.subr.bf16.mxu0 %v2026_v32  ;;  %1622 = vmatprep.subr.bf16.mxu1 %v2028_v33  ;;  %v3673_v32 = vld [vmem:[#allocation39_spill] sm:$0xff] }
 0x38c   :  { %v2074_v33 = vcombine.high %v3673_v32, %v3672_v26 }
 0x38e   :  { %1570 = vmatpush1.bf16.msra.mxu0 %v2025_v36  ;;  %1623 = vmatpush1.bf16.msra.mxu1 %v2027_v37  ;;  %v3674_v36 = vld [vmem:[#allocation44_spill] sm:$0xff] }
 0x38f   :  { %1571 = vmatprep.subr.bf16.mxu0 %v2018_v24  ;;  %1624 = vmatprep.subr.bf16.mxu1 %v2020_v25  ;;  %v3675_v37 = vld [vmem:[#allocation40_spill] sm:$0xff]  ;;  %v2073_v25 = vcombine.low %v3673_v32, %v3672_v26  ;;  %v3702_v26 = vld [vmem:[#allocation14_spill] sm:$0xff] }
 0x390   :  { %v2076_v24 = vcombine.high %v3675_v37, %v3674_v36  ;;  %v3703_v32 = vld [vmem:[#allocation12_spill] sm:$0xff] }
 0x392   :  { %1572 = vmatpush1.bf16.msra.mxu0 %v2017_v28  ;;  %1625 = vmatpush1.bf16.msra.mxu1 %v2019_v29  ;;  %v2075_v28 = vcombine.low %v3675_v37, %v3674_v36  ;;  %v3676_v29 = vld [vmem:[#allocation37_spill] sm:$0xff]  ;;  %v2023_v37 = vcombine.low %v3703_v32, %v3702_v26 }
 0x393   :  { %1573 = vmatprep.subr.bf16.mxu0 %v2010_v16  ;;  %1626 = vmatprep.subr.bf16.mxu1 %v2012_v17  ;;  %v3677_v16 = vld [vmem:[#allocation35_spill] sm:$0xff] }
 0x394   :  { %v2070_v17 = vcombine.high %v3677_v16, %v3676_v29 }
 0x396   :  { %1574 = vmatpush1.bf16.msra.mxu0 %v2009_v20  ;;  %1627 = vmatpush1.bf16.msra.mxu1 %v2011_v21  ;;  %v3678_v20 = vld [vmem:[#allocation38_spill] sm:$0xff]  ;;  %v3679_v21 = vld [vmem:[#allocation36_spill] sm:$0xff] }
 0x397   :  { %1575 = vmatprep.subr.bf16.mxu0 %v2130_v8  ;;  %1628 = vmatprep.subr.bf16.mxu1 %v2132_v9  ;;  %v2072_v8 = vcombine.high %v3679_v21, %v3678_v20  ;;  %v3204_v9 = vld [vmem:[#allocation3] ss:$8 sps:$4 sm:$0xff]  }
 0x39a   :  { %1576 = vmatpush2.bf16.msra.mxu0 %v2129_v12  ;;  %1629 = vmatpush2.bf16.msra.mxu1 %v2131_v13  ;;  %v2069_v12 = vcombine.low %v3677_v16, %v3676_v29  ;;  %v2071_v13 = vcombine.low %v3679_v21, %v3678_v20  ;;  %v3706_v29 = vld [vmem:[#allocation10_spill] sm:$0xff]  ;;  %v3707_v16 = vld [vmem:[#allocation8_spill] sm:$0xff] }
 0x39b   :  { %1577 = vmatprep.subr.bf16.mxu0 %v2122_v0  ;;  %1630 = vmatprep.subr.bf16.mxu1 %v2124_v1  ;;  %v3680_v0 = vld [vmem:[#allocation33_spill] sm:$0xff]  ;;  %v3681_v1 = vld [vmem:[#allocation31_spill] sm:$0xff]  ;;  %v2015_v21 = vcombine.low %v3707_v16, %v3706_v29 }
 0x39c   :  { %v2061_v62 = vcombine.low %v3681_v1, %v3680_v0 }
 0x39e   :  { %1578 = vmatpush2.bf16.msra.mxu0 %v2121_v4  ;;  %1631 = vmatpush2.bf16.msra.mxu1 %v2123_v5  ;;  %v2062_v4 = vcombine.high %v3681_v1, %v3680_v0  ;;  %v3682_v5 = vld [vmem:[#allocation34_spill] sm:$0xff]  ;;  %v3711_v1 = vld [vmem:[#allocation92_spill] sm:$0xff] }
 0x39f   :  { %1579 = vmatprep.subr.bf16.mxu0 %v2114_v59  ;;  %1632 = vmatprep.subr.bf16.mxu1 %v2116_v39  ;;  %v2064_v15 = vcombine.high %v3683_v50, %v3682_v5  ;;  %v3214_v59 = vld [vmem:[#allocation3 + $0x14] ss:$8 sps:$4 sm:$0xff]   ;;  %v2063_v38 = vcombine.low %v3683_v50, %v3682_v5 }
 0x3a0   :  { %v3684_v39 = vld [vmem:[#allocation29_spill] sm:$0xff]  ;;  %v3710_v0 = vld [vmem:[#allocation94_spill] sm:$0xff] }
 0x3a1   :  { %v2135_v50 = vcombine.low %v3711_v1, %v3710_v0 }
 0x3a2   :  { %1580 = vmatpush2.bf16.msra.mxu0 %v2113_v47  ;;  %1633 = vmatpush2.bf16.msra.mxu1 %v2115_v35  ;;  %v3685_v47 = vld [vmem:[#allocation27_spill] sm:$0xff] }
 0x3a3   :  { %1581 = vmatprep.subr.bf16.mxu0 %v2106_v54  ;;  %1634 = vmatprep.subr.bf16.mxu1 %v2108_v46  ;;  %v2054_v35 = vcombine.high %v3685_v47, %v3684_v39  ;;  %v2056_v54 = vcombine.high %v3687_v51, %v3686_v42  ;;  %v2053_v55 = vcombine.low %v3685_v47, %v3684_v39  ;;  %v3714_v39 = vld [vmem:[#allocation90_spill] sm:$0xff]  ;;  %v3715_v47 = vld [vmem:[#allocation88_spill] sm:$0xff] }
 0x3a4   :  { %v2055_v46 = vcombine.low %v3687_v51, %v3686_v42  ;;  %v2127_v51 = vcombine.low %v3715_v47, %v3714_v39 }
 0x3a6   :  { %1582 = vmatpush2.bf16.msra.mxu0 %v2105_v23  ;;  %1635 = vmatpush2.bf16.msra.mxu1 %v2107_v34  ;;  %v3688_v23 = vld [vmem:[#allocation25_spill] sm:$0xff]  ;;  %v3689_v34 = vld [vmem:[#allocation23_spill] sm:$0xff] }
 0x3a7   :  { %1583 = vmatprep.subr.bf16.mxu0 %v2098_v58  ;;  %1636 = vmatprep.subr.bf16.mxu1 %v2100_v6  ;;  %v2046_v43 = vcombine.high %v3689_v34, %v3688_v23  ;;  %v3691_v58 = vld [vmem:[#allocation24_spill] sm:$0xff]  ;;  %v2045_v14 = vcombine.low %v3689_v34, %v3688_v23  ;;  %v3718_v23 = vld [vmem:[#allocation86_spill] sm:$0xff] }
 0x3a8   :  { %v2048_v7 = vcombine.high %v3691_v58, %v3690_v11  ;;  %v2047_v6 = vcombine.low %v3691_v58, %v3690_v11  ;;  %v3719_v34 = vld [vmem:[#allocation82_spill] sm:$0xff] }
 0x3a9   :  { %v2119_v58 = vcombine.low %v3719_v34, %v3718_v23 }
 0x3aa   :  { %1584 = vmatpush2.bf16.msra.mxu0 %v2097_v2  ;;  %1637 = vmatpush2.bf16.msra.mxu1 %v2099_v10  ;;  %v3692_v2 = vld [vmem:[#allocation21_spill] sm:$0xff]  ;;  %v3693_v10 = vld [vmem:[#allocation19_spill] sm:$0xff] }
 0x3ab   :  { %1585 = vmatprep.subr.bf16.mxu0 %v2090_v27  ;;  %1638 = vmatprep.subr.bf16.mxu1 %v2092_v57  ;;  %v2038_v22 = vcombine.high %v3693_v10, %v3692_v2  ;;  %v3695_v27 = vld [vmem:[#allocation20_spill] sm:$0xff]  ;;  %v2037_v56 = vcombine.low %v3693_v10, %v3692_v2  ;;  %v3722_v2 = vld [vmem:[#allocation78_spill] sm:$0xff] }
 0x3ac   :  { %v2040_v18 = vcombine.high %v3695_v27, %v3694_v19  ;;  %v2039_v57 = vcombine.low %v3695_v27, %v3694_v19  ;;  %v3723_v10 = vld [vmem:[#allocation74_spill] sm:$0xff] }
 0x3ad   :  { %v2111_v27 = vcombine.low %v3723_v10, %v3722_v2 }
 0x3ae   :  { %1586 = vmatpush2.bf16.msra.mxu0 %v2089_v60  ;;  %1639 = vmatpush2.bf16.msra.mxu1 %v2091_v61  ;;  %v3696_v60 = vld [vmem:[#allocation17_spill] sm:$0xff]  ;;  %v3697_v61 = vld [vmem:[#allocation15_spill] sm:$0xff] }
 0x3af   :  { %1587 = vmatprep.subr.bf16.mxu0 %v2082_v52  ;;  %1640 = vmatprep.subr.bf16.mxu1 %v2084_v44  ;;  %v2030_v30 = vcombine.high %v3697_v61, %v3696_v60  ;;  %v3699_v52 = vld [vmem:[#allocation16_spill] sm:$0xff]  ;;  %v3700_v44 = vld [vmem:[#allocation13_spill] sm:$0xff] }
 0x3b0   :  { %v2032_v40 = vcombine.high %v3699_v52, %v3698_v49  ;;  %v2031_v41 = vcombine.low %v3699_v52, %v3698_v49 }
 0x3b2   :  { %1588 = vmatpush2.bf16.msra.mxu0 %v2081_v45  ;;  %1641 = vmatpush2.bf16.msra.mxu1 %v2083_v53  ;;  %v3701_v45 = vld [vmem:[#allocation11_spill] sm:$0xff] }
 0x3b3   :  { %1589 = vmatprep.subr.bf16.mxu0 %v2074_v33  ;;  %1642 = vmatprep.subr.bf16.mxu1 %v2076_v24  ;;  %v2022_v53 = vcombine.high %v3701_v45, %v3700_v44  ;;  %v2024_v33 = vcombine.high %v3703_v32, %v3702_v26  ;;  %v2021_v36 = vcombine.low %v3701_v45, %v3700_v44  ;;  %v3704_v24 = vld [vmem:[#allocation9_spill] sm:$0xff]  ;;  %v3730_v44 = vld [vmem:[#allocation62_spill] sm:$0xff] }
 0x3b4   :  { %v3731_v45 = vld [vmem:[#allocation58_spill] sm:$0xff] }
 0x3b5   :  { %v2095_v32 = vcombine.low %v3731_v45, %v3730_v44 }
 0x3b6   :  { %1590 = vmatpush2.bf16.msra.mxu0 %v2073_v25  ;;  %1643 = vmatpush2.bf16.msra.mxu1 %v2075_v28  ;;  %v3705_v25 = vld [vmem:[#allocation7_spill] sm:$0xff] }
 0x3b7   :  { %1665 = vmatprep.subr.bf16.mxu0 %v2070_v17  ;;  %1718 = vmatprep.subr.bf16.mxu1 %v2072_v8  ;;  %v2014_v28 = vcombine.high %v3705_v25, %v3704_v24  ;;  %v2016_v17 = vcombine.high %v3707_v16, %v3706_v29  ;;  %v2013_v20 = vcombine.low %v3705_v25, %v3704_v24  ;;  %v3708_v8 = vld [vmem:[#allocation93_spill] sm:$0xff]  ;;  %v3734_v24 = vld [vmem:[#allocation54_spill] sm:$0xff] }
 0x3b8   :  { %v3735_v25 = vld [vmem:[#allocation50_spill] sm:$0xff] }
 0x3b9   :  { %1592 = vmatmul.mubr.bf16.vlgmr.msra.gmra.mxu0 %v3204_v9  ;;  %1645 = vmatmul.mubr.bf16.vlgmr.msra.gmra.mxu1 %v3204_v9  ;;  %v2087_v16 = vcombine.low %v3735_v25, %v3734_v24 }
 0x3ba   :  { %1666 = vmatpush1.bf16.msra.mxu0 %v2069_v12  ;;  %1719 = vmatpush1.bf16.msra.mxu1 %v2071_v13  ;;  %v3709_v12 = vld [vmem:[#allocation91_spill] sm:$0xff] }
 0x3bb   :  { %1667 = vmatprep.subr.bf16.mxu0 %v2062_v4  ;;  %1720 = vmatprep.subr.bf16.mxu1 %v2064_v15  ;;  %v2134_v13 = vcombine.high %v3709_v12, %v3708_v8  ;;  %v2136_v4 = vcombine.high %v3711_v1, %v3710_v0  ;;  %v2133_v5 = vcombine.low %v3709_v12, %v3708_v8  ;;  %v3712_v15 = vld [vmem:[#allocation89_spill] sm:$0xff]  ;;  %v3738_v8 = vld [vmem:[#allocation46_spill] sm:$0xff] }
 0x3bc   :  { %1601 = vmatprep.mubr.bf16.mxu0 %v3214_v59  ;;  %1654 = vmatprep.mubr.bf16.mxu1 %v3214_v59  ;;  %v3739_v12 = vld [vmem:[#allocation42_spill] sm:$0xff] }
 0x3bd   :  { %v2079_v1 = vcombine.low %v3739_v12, %v3738_v8 }
 0x3be   :  { %1668 = vmatpush1.bf16.msra.mxu0 %v2061_v62  ;;  %1721 = vmatpush1.bf16.msra.mxu1 %v2063_v38  ;;  %v3713_v62 = vld [vmem:[#allocation87_spill] sm:$0xff] }
 0x3bf   :  { %1669 = vmatprep.subr.bf16.mxu0 %v2054_v35  ;;  %1722 = vmatprep.subr.bf16.mxu1 %v2056_v54  ;;  %v2126_v38 = vcombine.high %v3713_v62, %v3712_v15  ;;  %v2128_v35 = vcombine.high %v3715_v47, %v3714_v39  ;;  %v2125_v42 = vcombine.low %v3713_v62, %v3712_v15  ;;  %v3716_v54 = vld [vmem:[#allocation85_spill] sm:$0xff]  ;;  %v869_v62 = vsub.s32 2, %v3055_v3 }
 0x3c1   :  { %1602 = vmatmul.mubr.bf16.gmra.mxu0 %v3228_v63  ;;  %1655 = vmatmul.mubr.bf16.gmra.mxu1 %v3228_v63  ;;  %v870_v47 = vrot.slane %v3061_v31, %v869_v62 }
 0x3c2   :  { %1670 = vmatpush1.bf16.msra.mxu0 %v2053_v55  ;;  %1723 = vmatpush1.bf16.msra.mxu1 %v2055_v46  ;;  %v3717_v55 = vld [vmem:[#allocation81_spill] sm:$0xff] }
 0x3c3   :  { %1671 = vmatprep.subr.bf16.mxu0 %v2046_v43  ;;  %1724 = vmatprep.subr.bf16.mxu1 %v2048_v7  ;;  %v2118_v46 = vcombine.high %v3717_v55, %v3716_v54  ;;  %v2120_v43 = vcombine.high %v3719_v34, %v3718_v23  ;;  %v2117_v11 = vcombine.low %v3717_v55, %v3716_v54  ;;  %v3720_v7 = vld [vmem:[#allocation77_spill] sm:$0xff]  ;;  %v3741_v54 = vld [vmem:[#allocation96_spill] sm:$0xff] }
 0x3c4   :  { %1697 = vmatprep.mubr.bf16.mxu0 %v3092_v48  ;;  %1750 = vmatprep.mubr.bf16.mxu1 %v3092_v48  ;;  %v2029_v48 = vcombine.low %v3697_v61, %v3696_v60  ;;  %v3726_v60 = vld [vmem:[#allocation70_spill] sm:$0xff]  ;;  %v878_v55 = vrot.slane %v3741_v54, %v869_v62 }
 0x3c5   :  { %v3727_v61 = vld [vmem:[#allocation66_spill] sm:$0xff] }
 0x3c6   :  { %1672 = vmatpush1.bf16.msra.mxu0 %v2045_v14  ;;  %1725 = vmatpush1.bf16.msra.mxu1 %v2047_v6  ;;  %v3721_v14 = vld [vmem:[#allocation73_spill] sm:$0xff]  ;;  %v2103_v52 = vcombine.low %v3727_v61, %v3726_v60 }
 0x3c7   :  { %1673 = vmatprep.subr.bf16.mxu0 %v2038_v22  ;;  %1726 = vmatprep.subr.bf16.mxu1 %v2040_v18  ;;  %v2110_v6 = vcombine.high %v3721_v14, %v3720_v7  ;;  %v2112_v22 = vcombine.high %v3723_v10, %v3722_v2  ;;  %v2109_v19 = vcombine.low %v3721_v14, %v3720_v7  ;;  %v3724_v18 = vld [vmem:[#allocation69_spill] sm:$0xff] }
 0x3c8   :  { %v3742_v14 = vld [vmem:[#allocation97_spill] sm:$0xff] }
 0x3ca   :  { %1674 = vmatpush1.bf16.msra.mxu0 %v2037_v56  ;;  %1727 = vmatpush1.bf16.msra.mxu1 %v2039_v57  ;;  %v3725_v56 = vld [vmem:[#allocation65_spill] sm:$0xff] }
 0x3cb   :  { %1675 = vmatprep.subr.bf16.mxu0 %v2030_v30  ;;  %1728 = vmatprep.subr.bf16.mxu1 %v2032_v40  ;;  %v2102_v57 = vcombine.high %v3725_v56, %v3724_v18  ;;  %v2104_v30 = vcombine.high %v3727_v61, %v3726_v60  ;;  %v2101_v49 = vcombine.low %v3725_v56, %v3724_v18  ;;  %v3728_v40 = vld [vmem:[#allocation61_spill] sm:$0xff] }
 0x3ce   :  { %1676 = vmatpush1.bf16.msra.mxu0 %v2029_v48  ;;  %1729 = vmatpush1.bf16.msra.mxu1 %v2031_v41  ;;  %v3729_v48 = vld [vmem:[#allocation57_spill] sm:$0xff] }
 0x3cf   :  { %1677 = vmatprep.subr.bf16.mxu0 %v2022_v53  ;;  %1730 = vmatprep.subr.bf16.mxu1 %v2024_v33  ;;  %v2094_v41 = vcombine.high %v3729_v48, %v3728_v40  ;;  %v2096_v53 = vcombine.high %v3731_v45, %v3730_v44  ;;  %v2093_v26 = vcombine.low %v3729_v48, %v3728_v40  ;;  %v3732_v33 = vld [vmem:[#allocation53_spill] sm:$0xff] }
 0x3d2   :  { %1678 = vmatpush1.bf16.msra.mxu0 %v2021_v36  ;;  %1731 = vmatpush1.bf16.msra.mxu1 %v2023_v37  ;;  %v3733_v36 = vld [vmem:[#allocation49_spill] sm:$0xff] }
 0x3d3   :  { %1679 = vmatprep.subr.bf16.mxu0 %v2014_v28  ;;  %1732 = vmatprep.subr.bf16.mxu1 %v2016_v17  ;;  %v2086_v37 = vcombine.high %v3733_v36, %v3732_v33  ;;  %v2088_v28 = vcombine.high %v3735_v25, %v3734_v24  ;;  %v2085_v29 = vcombine.low %v3733_v36, %v3732_v33  ;;  %v3736_v17 = vld [vmem:[#allocation45_spill] sm:$0xff] }
 0x3d6   :  { %1680 = vmatpush1.bf16.msra.mxu0 %v2013_v20  ;;  %1733 = vmatpush1.bf16.msra.mxu1 %v2015_v21  ;;  %v3737_v20 = vld [vmem:[#allocation41_spill] sm:$0xff] }
 0x3d7   :  { %1681 = vmatprep.subr.bf16.mxu0 %v2134_v13  ;;  %1734 = vmatprep.subr.bf16.mxu1 %v2136_v4  ;;  %v2078_v21 = vcombine.high %v3737_v20, %v3736_v17  ;;  %v2080_v13 = vcombine.high %v3739_v12, %v3738_v8  ;;  %v2077_v0 = vcombine.low %v3737_v20, %v3736_v17 }
 0x3da   :  { %1682 = vmatpush2.bf16.msra.mxu0 %v2133_v5  ;;  %1735 = vmatpush2.bf16.msra.mxu1 %v2135_v50 }
 0x3db   :  { %1683 = vmatprep.subr.bf16.mxu0 %v2126_v38  ;;  %1736 = vmatprep.subr.bf16.mxu1 %v2128_v35  ;;  %v3740_v35 = vld [vmem:[#allocation95_spill] sm:$0xff] }
 0x3de   :  { %1684 = vmatpush2.bf16.msra.mxu0 %v2125_v42  ;;  %1737 = vmatpush2.bf16.msra.mxu1 %v2127_v51 }
 0x3df   :  { %1685 = vmatprep.subr.bf16.mxu0 %v2118_v46  ;;  %1738 = vmatprep.subr.bf16.mxu1 %v2120_v43 }
 0x3e2   :  { %1686 = vmatpush2.bf16.msra.mxu0 %v2117_v11  ;;  %1739 = vmatpush2.bf16.msra.mxu1 %v2119_v58 }
 0x3e3   :  { %1687 = vmatprep.subr.bf16.mxu0 %v2110_v6  ;;  %1740 = vmatprep.subr.bf16.mxu1 %v2112_v22  ;;  %v882_v6 = vrot.slane %v3742_v14, %v869_v62 }
 0x3e6   :  { %1688 = vmatpush2.bf16.msra.mxu0 %v2109_v19  ;;  %1741 = vmatpush2.bf16.msra.mxu1 %v2111_v27 }
 0x3e7   :  { %1689 = vmatprep.subr.bf16.mxu0 %v2102_v57  ;;  %1742 = vmatprep.subr.bf16.mxu1 %v2104_v30 }
 0x3ea   :  { %1690 = vmatpush2.bf16.msra.mxu0 %v2101_v49  ;;  %1743 = vmatpush2.bf16.msra.mxu1 %v2103_v52 }
 0x3eb   :  { %1691 = vmatprep.subr.bf16.mxu0 %v2094_v41  ;;  %1744 = vmatprep.subr.bf16.mxu1 %v2096_v53 }
 0x3ee   :  { %1692 = vmatpush2.bf16.msra.mxu0 %v2093_v26  ;;  %1745 = vmatpush2.bf16.msra.mxu1 %v2095_v32 }
 0x3ef   :  { %1693 = vmatprep.subr.bf16.mxu0 %v2086_v37  ;;  %1746 = vmatprep.subr.bf16.mxu1 %v2088_v28  ;;  %v3743_v37 = vld [vmem:[#allocation98_spill] sm:$0xff]  ;;  %v3744_v28 = vld [vmem:[#allocation99_spill] sm:$0xff] }
 0x3f0   :  { %v3372_v24 = vrot.slane %v3743_v37, %v869_v62 }
 0x3f2   :  { %1694 = vmatpush2.bf16.msra.mxu0 %v2085_v29  ;;  %1747 = vmatpush2.bf16.msra.mxu1 %v2087_v16  ;;  %v3379_v29 = vrot.slane %v3744_v28, %v869_v62 }
 0x3f3   :  { %1695 = vmatprep.subr.bf16.mxu0 %v2078_v21  ;;  %1748 = vmatprep.subr.bf16.mxu1 %v2080_v13 }
 0x3f6   :  { %1696 = vmatpush2.bf16.msra.mxu0 %v2077_v0  ;;  %1749 = vmatpush2.bf16.msra.mxu1 %v2079_v1 }
 0x3f9   :  { %1698 = vmatmul.mubr.bf16.vlgmr.msra.gmra.mxu0 %v3204_v9  ;;  %1751 = vmatmul.mubr.bf16.vlgmr.msra.gmra.mxu1 %v3204_v9  ;;  %v874_v9 = vrot.slane %v3740_v35, %v869_v62 }
 0x3fa   :  { %1707 = vmatprep.mubr.bf16.mxu0 %v3214_v59  ;;  %1760 = vmatprep.mubr.bf16.mxu1 %v3214_v59  ;;  %v3352_v59 = vsub.s32 3, %v3055_v3 }
 0x3fc   :  { %v3357_v58 = vrot.slane %v3061_v31, %v3352_v59  ;;  %v1810_v22 = vrot.slane %v3740_v35, %v3352_v59  ;;  %v3364_v30 = vrot.slane %v3741_v54, %v3352_v59  ;;  %v3369_v45 = vrot.slane %v3742_v14, %v3352_v59  ;;  %v3745_v35 = vld [vmem:[#allocation100_spill] sm:$0xff] }
 0x3fd   :  { %v3376_v25 = vrot.slane %v3743_v37, %v3352_v59 }
 0x401   :  { %1708 = vmatmul.mubr.bf16.gmra.mxu0 %v3228_v63  ;;  %1761 = vmatmul.mubr.bf16.gmra.mxu1 %v3228_v63 }
 0x479   :  { %v1593_v4 = vpop.f32.mrf.mxu0  ;;  %v1646_v50 = vpop.f32.mrf.mxu1 }
 0x47a   :  { %v1594_v63 = vadd.f32 %v1593_v4, %v870_v47  ;;  %v1647_v7 = vadd.f32 %v1646_v50, %v878_v55 }
 0x47b   :  { %v1595_v5 = vpop.f32.mrf.mxu0  ;;  %v1648_v38 = vpop.f32.mrf.mxu1 }
 0x47c   :  { %v1596_v46 = vadd.f32 %v1595_v5, %v874_v9  ;;  %v1771_v2 = vmax.f32 %v1594_v63, 0.0  ;;  %v1773_v61 = vmax.f32 %v1647_v7, 0.0  ;;  %v1649_v49 = vadd.f32 %v1648_v38, %v882_v6 }
 0x47d   :  { %v1597_v15 = vpop.f32.mrf.mxu0  ;;  %v1650_v42 = vpop.f32.mrf.mxu1 }
 0x47e   :  { %v1772_v10 = vmax.f32 %v1596_v46, 0.0  ;;  %v1598_v19 = vadd.f32 %v1597_v15, %v870_v47  ;;  %v1835_v52 = vmul.f32 %v3357_v58, %v1771_v2  ;;  %v1651_v41 = vadd.f32 %v1650_v42, %v878_v55 }
 0x47f   :  { %v1599_v39 = vpop.f32.mrf.mxu0  ;;  %v1652_v23 = vpop.f32.mrf.mxu1  ;;  %v1837_v16 = vmul.f32 %v3364_v30, %v1773_v61  ;;  %v1774_v12 = vmax.f32 %v1649_v49, 0.0  ;;  %v3385_v42 = vrot.slane %v3745_v35, %v869_v62  ;;  %v3392_v46 = vrot.slane %v3744_v28, %v3352_v59 }
 0x480   :  { %v1600_v43 = vadd.f32 %v1599_v39, %v874_v9  ;;  %v1836_v40 = vmul.f32 %v1810_v22, %v1772_v10  ;;  %v1779_v48 = vmax.f32 %v1598_v19, 0.0  ;;  %v1653_v17 = vadd.f32 %v1652_v23, %v882_v6 }
 0x481   :  { %v1603_v51 = vpop.f32.mrf.mxu0  ;;  %v1656_v11 = vpop.f32.mrf.mxu1  ;;  %v1781_v0 = vmax.f32 %v1651_v41, 0.0  ;;  %v1838_v23 = vmul.f32 %v3369_v45, %v1774_v12 }
 0x482   :  { %v1604_v18 = vadd.f32 %v1603_v51, %v870_v47  ;;  %v1780_v57 = vmax.f32 %v1600_v43, 0.0  ;;  %v1657_v32 = vadd.f32 %v1656_v11, %v878_v55  ;;  %v1867_v8 = vadd.f32 %v1836_v40, %v1835_v52  ;;  %v3746_v51 = vld [vmem:[#allocation101_spill] sm:$0xff] }
 0x483   :  { %v1605_v34 = vpop.f32.mrf.mxu0  ;;  %v1658_v60 = vpop.f32.mrf.mxu1  ;;  %v1843_v13 = vmul.f32 %v3357_v58, %v1779_v48  ;;  %v3388_v54 = vrot.slane %v3746_v51, %v869_v62  ;;  %v1845_v43 = vmul.f32 %v3364_v30, %v1781_v0  ;;  %v3407_v40 = vrot.slane %v3746_v51, %v3352_v59 }
 0x484   :  { %v1606_v56 = vadd.f32 %v1605_v34, %v874_v9  ;;  %v1787_v53 = vmax.f32 %v1604_v18, 0.0  ;;  %v1844_v33 = vmul.f32 %v1810_v22, %v1780_v57  ;;  %v1789_v5 = vmax.f32 %v1657_v32, 0.0 }
 0x485   :  { %v1607_v27 = vpop.f32.mrf.mxu0  ;;  %v1660_v36 = vpop.f32.mrf.mxu1  ;;  %v1659_v50 = vadd.f32 %v1658_v60, %v882_v6  ;;  %v1868_v34 = vadd.f32 %v1867_v8, %v1837_v16 }
 0x486   :  { %v1788_v26 = vmax.f32 %v1606_v56, 0.0  ;;  %v1608_v20 = vadd.f32 %v1607_v27, %v870_v47  ;;  %v1851_v1 = vmul.f32 %v3357_v58, %v1787_v53  ;;  %v1876_v15 = vadd.f32 %v1844_v33, %v1843_v13 }
 0x487   :  { %v1609_v44 = vpop.f32.mrf.mxu0  ;;  %v1661_v38 = vadd.f32 %v1660_v36, %v878_v55  ;;  %v1662_v39 = vpop.f32.mrf.mxu1  ;;  %v1782_v47 = vmax.f32 %v1653_v17, 0.0  ;;  %v3398_v55 = vrot.slane %v3745_v35, %v3352_v59  ;;  %v1853_v62 = vmul.f32 %v3364_v30, %v1789_v5 }
 0x488   :  { %v1610_v21 = vadd.f32 %v1609_v44, %v874_v9  ;;  %v1852_v4 = vmul.f32 %v1810_v22, %v1788_v26  ;;  %v1795_v9 = vmax.f32 %v1608_v20, 0.0  ;;  %v1790_v7 = vmax.f32 %v1659_v50, 0.0 }
 0x489   :  { %v1663_v14 = vadd.f32 %v1662_v39, %v882_v6  ;;  %v1877_v19 = vadd.f32 %v1876_v15, %v1845_v43  ;;  %v1797_v27 = vmax.f32 %v1661_v38, 0.0  ;;  %v1846_v57 = vmul.f32 %v3369_v45, %v1782_v47 }
 0x48a   :  { %v1796_v63 = vmax.f32 %v1610_v21, 0.0  ;;  %v1885_v11 = vadd.f32 %v1852_v4, %v1851_v1  ;;  %v1859_v60 = vmul.f32 %v3357_v58, %v1795_v9  ;;  %v1869_v6 = vadd.f32 %v1868_v34, %v1838_v23 }
 0x48b   :  { %v1854_v26 = vmul.f32 %v3369_v45, %v1790_v7  ;;  %v1798_v32 = vmax.f32 %v1663_v14, 0.0  ;;  %v1861_v37 = vmul.f32 %v3364_v30, %v1797_v27 }
 0x48c   :  { %v1860_v61 = vmul.f32 %v1810_v22, %v1796_v63  ;;  %v1886_v53 = vadd.f32 %v1885_v11, %v1853_v62  ;;  %v1878_v22 = vadd.f32 %v1877_v19, %v1846_v57 }
 0x48d   :  { %v1862_v30 = vmul.f32 %v3369_v45, %v1798_v32 }
 0x48e   :  { %v1894_v16 = vadd.f32 %v1860_v61, %v1859_v60  ;;  %v1887_v5 = vadd.f32 %v1886_v53, %v1854_v26 }
 0x490   :  { %v1895_v63 = vadd.f32 %v1894_v16, %v1861_v37 }
 0x4b9   :  { %v1699_v2 = vpop.f32.mrf.mxu0  ;;  %v1752_v10 = vpop.f32.mrf.mxu1 }
 0x4ba   :  { %v1700_v18 = vadd.f32 %v1699_v2, %v3372_v24  ;;  %v1753_v56 = vadd.f32 %v1752_v10, %v3385_v42 }
 0x4bb   :  { %v1701_v49 = vpop.f32.mrf.mxu0  ;;  %v1754_v52 = vpop.f32.mrf.mxu1 }
 0x4bc   :  { %v1775_v48 = vmax.f32 %v1700_v18, 0.0  ;;  %v1702_v41 = vadd.f32 %v1701_v49, %v3379_v29  ;;  %v1755_v44 = vadd.f32 %v1754_v52, %v3388_v54  ;;  %v1777_v33 = vmax.f32 %v1753_v56, 0.0 }
 0x4bd   :  { %v1703_v36 = vpop.f32.mrf.mxu0  ;;  %v1756_v58 = vpop.f32.mrf.mxu1 }
 0x4be   :  { %v1839_v28 = vmul.f32 %v3376_v25, %v1775_v48  ;;  %v1776_v59 = vmax.f32 %v1702_v41, 0.0  ;;  %v1778_v17 = vmax.f32 %v1755_v44, 0.0  ;;  %v1704_v20 = vadd.f32 %v1703_v36, %v3372_v24 }
 0x4bf   :  { %v1757_v21 = vadd.f32 %v1756_v58, %v3385_v42  ;;  %v1705_v8 = vpop.f32.mrf.mxu0  ;;  %v1758_v12 = vpop.f32.mrf.mxu1  ;;  %v1841_v50 = vmul.f32 %v3398_v55, %v1777_v33 }
 0x4c0   :  { %v1870_v13 = vadd.f32 %v1869_v6, %v1839_v28  ;;  %v1840_v0 = vmul.f32 %v3392_v46, %v1776_v59  ;;  %v1706_v1 = vadd.f32 %v1705_v8, %v3379_v29  ;;  %v1759_v4 = vadd.f32 %v1758_v12, %v3388_v54 }
 0x4c1   :  { %v1783_v15 = vmax.f32 %v1704_v20, 0.0  ;;  %v1709_v38 = vpop.f32.mrf.mxu0  ;;  %v1762_v39 = vpop.f32.mrf.mxu1  ;;  %v1785_v35 = vmax.f32 %v1757_v21, 0.0  ;;  %v1842_v2 = vmul.f32 %v3407_v40, %v1778_v17  ;;  %v1896_v28 = vadd.f32 %v1895_v63, %v1862_v30 }
 0x4c2   :  { %v1784_v51 = vmax.f32 %v1706_v1, 0.0  ;;  %v1710_v47 = vadd.f32 %v1709_v38, %v3372_v24  ;;  %v1763_v9 = vadd.f32 %v1762_v39, %v3385_v42  ;;  %v1786_v34 = vmax.f32 %v1759_v4, 0.0 }
 0x4c3   :  { %v1847_v23 = vmul.f32 %v3376_v25, %v1783_v15  ;;  %v1711_v43 = vpop.f32.mrf.mxu0  ;;  %v1764_v11 = vpop.f32.mrf.mxu1  ;;  %v1871_v62 = vadd.f32 %v1870_v13, %v1840_v0  ;;  %v1849_v60 = vmul.f32 %v3398_v55, %v1785_v35 }
 0x4c4   :  { %v1848_v45 = vmul.f32 %v3392_v46, %v1784_v51  ;;  %v1791_v7 = vmax.f32 %v1710_v47, 0.0  ;;  %v1793_v14 = vmax.f32 %v1763_v9, 0.0  ;;  %v1712_v19 = vadd.f32 %v1711_v43, %v3379_v29 }
 0x4c5   :  { %v1879_v10 = vadd.f32 %v1878_v22, %v1847_v23  ;;  %v1765_v27 = vadd.f32 %v1764_v11, %v3388_v54  ;;  %v1713_v18 = vpop.f32.mrf.mxu0  ;;  %v1766_v56 = vpop.f32.mrf.mxu1  ;;  %v1872_v57 = vadd.f32 %v1871_v62, %v1841_v50  ;;  %v1850_v48 = vmul.f32 %v3407_v40, %v1786_v34 }
 0x4c6   :  { %v1855_v61 = vmul.f32 %v3376_v25, %v1791_v7  ;;  %v1714_v49 = vadd.f32 %v1713_v18, %v3372_v24  ;;  %v1767_v52 = vadd.f32 %v1766_v56, %v3385_v42  ;;  %v1792_v41 = vmax.f32 %v1712_v19, 0.0 }
 0x4c7   :  { %v1880_v6 = vadd.f32 %v1879_v10, %v1848_v45  ;;  %v1715_v44 = vpop.f32.mrf.mxu0  ;;  %v1768_v53 = vpop.f32.mrf.mxu1  ;;  %v1873_v26 = vadd.f32 %v1872_v57, %v1842_v2  ;;  %v1857_v33 = vmul.f32 %v3398_v55, %v1793_v14  ;;  %v1794_v37 = vmax.f32 %v1765_v27, 0.0 }
 0x4c8   :  { %v1888_v32 = vadd.f32 %v1887_v5, %v1855_v61  ;;  %v1799_v36 = vmax.f32 %v1714_v49, 0.0  ;;  %v1716_v58 = vadd.f32 %v1715_v44, %v3379_v29  ;;  %v1856_v22 = vmul.f32 %v3392_v46, %v1792_v41 }
 0x4c9   :  { %v1769_v24 = vadd.f32 %v1768_v53, %v3388_v54  ;;  %1874 = vadd.xlane.f32.xlu0 %v1873_v26  ;;  %v1881_v42 = vadd.f32 %v1880_v6, %v1849_v60  ;;  %v1801_v16 = vmax.f32 %v1767_v52, 0.0  ;;  %v1858_v29 = vmul.f32 %v3407_v40, %v1794_v37 }
 0x4ca   :  { %v1863_v59 = vmul.f32 %v3376_v25, %v1799_v36  ;;  %v1800_v17 = vmax.f32 %v1716_v58, 0.0  ;;  %v1889_v21 = vadd.f32 %v1888_v32, %v1856_v22  ;;  %v2277_v50 = vmov 0  }
 0x4cb   :  { %v1882_v20 = vadd.f32 %v1881_v42, %v1850_v48  ;;  %v1802_v13 = vmax.f32 %v1769_v24, 0.0  ;;  %v1865_v1 = vmul.f32 %v3398_v55, %v1801_v16  ;;  %2251 = vset.pattern.permute.xlu0 %v2277_v50  ;;  %2252 = vset.pattern.permute.xlu1 %v2277_v50 }
 0x4cc   :  { %v1897_v8 = vadd.f32 %v1896_v28, %v1863_v59  ;;  %v1864_v12 = vmul.f32 %v3392_v46, %v1800_v17  ;;  %v1890_v0 = vadd.f32 %v1889_v21, %v1857_v33  ;;  %v1905_v46 = vsub.s32 4, %v3055_v3 }
 0x4cd   :  { %1883 = vadd.xlane.f32.xlu0 %v1882_v20  ;;  %v1866_v5 = vmul.f32 %v3407_v40, %v1802_v13 }
 0x4ce   :  { %v1898_v54 = vadd.f32 %v1897_v8, %v1864_v12  ;;  %v1891_v4 = vadd.f32 %v1890_v0, %v1858_v29  ;;  %v1906_v15 = vrot.slane %v3061_v31, %v1905_v46 }
 0x4d0   :  { %v1899_v30 = vadd.f32 %v1898_v54, %v1865_v1  ;;  %1892 = vadd.xlane.f32.xlu1 %v1891_v4 }
 0x4d2   :  { %v1900_v25 = vadd.f32 %v1899_v30, %v1866_v5 }
 0x4d4   :  { %1901 = vadd.xlane.f32.xlu1 %v1900_v25 }
 0x552   :  { %v1875_v38 = vpop.xlane.xlu0 %1874 }
 0x553   :  { %v1907_v39 = vadd.f32 %v1906_v15, %v1875_v38 }
 0x555   :  { %v2137_v35 = vmul.f32 -1.442695, %v1907_v39 }
 0x556   :  { %v1884_v51 = vpop.xlane.xlu0 %1883 }
 0x557   :  { %2259 = vpow2.f32 %v2137_v35  ;;  %v1908_v55 = vadd.f32 %v1906_v15, %v1884_v51 }
 0x559   :  { %v2138_v47 = vmul.f32 -1.442695, %v1908_v55  ;;  %v1893_v9 = vpop.xlane.xlu1 %1892 }
 0x55a   :  { %v1909_v40 = vadd.f32 %v1906_v15, %v1893_v9 }
 0x55b   :  { %2261 = vpow2.f32 %v2138_v47 }
 0x55c   :  { %v2139_v63 = vmul.f32 -1.442695, %v1909_v40 }
 0x55d   :  { %v1902_v23 = vpop.xlane.xlu1 %1901 }
 0x55e   :  { %2263 = vpow2.f32 %v2139_v63  ;;  %v1910_v34 = vadd.f32 %v1906_v15, %v1902_v23 }
 0x560   :  { %v2140_v43 = vmul.f32 -1.442695, %v1910_v34 }
 0x562   :  { %2265 = vpow2.f32 %v2140_v43 }
 0x564   :  { %v2260_v11 = vpop.eup %2259 }
 0x565   :  { %v1923_v3 = vadd.f32 1.0, %v2260_v11 }
 0x567   :  { %2267 = vrcp.f32 %v1923_v3 }
 0x568   :  { %v2262_v31 = vpop.eup %2261 }
 0x569   :  { %v1924_v62 = vadd.f32 1.0, %v2262_v31 }
 0x56b   :  { %2269 = vrcp.f32 %v1924_v62  ;;  %v2264_v45 = vpop.eup %2263 }
 0x56c   :  { %v1925_v7 = vadd.f32 1.0, %v2264_v45 }
 0x56e   :  { %2271 = vrcp.f32 %v1925_v7 }
 0x56f   :  { %v2266_v14 = vpop.eup %2265 }
 0x570   :  { %v1926_v2 = vadd.f32 1.0, %v2266_v14 }
 0x572   :  { %2273 = vrcp.f32 %v1926_v2 }
 0x574   :  { %v2268_v10 = vpop.eup %2267 }
 0x575   :  { %1937 = vperm.xlu0 %2251, %v2268_v10  }
 0x578   :  { %v2270_v19 = vpop.eup %2269 }
 0x579   :  { %1942 = vperm.xlu1 %2252, %v2270_v19  }
 0x57b   :  { %v2272_v27 = vpop.eup %2271 }
 0x57d   :  { %1947 = vperm.xlu1 %2252, %v2272_v27  }
 0x57f   :  { %v2274_v18 = vpop.eup %2273 }
 0x581   :  { %1952 = vperm.xlu1 %2252, %v2274_v18  }
 0x5f0   :  { %v1938_v56 = vpop.permute.xlu0 %1937 }
 0x5f1   :  { %1955 = vst [vmem:[%s3461_s5] sm:$0xff] %v1938_v56 }
 0x5f4   :  { %v1943_v57 = vpop.permute.xlu1 %1942 }
 0x5f5   :  { %1956 = vst [vmem:[%s3461_s5 + $0x8] sm:$0xff] %v1943_v57 }
 0x5f8   :  { %v1948_v60 = vpop.permute.xlu1 %1947 }
 0x5f9   :  { %1957 = vst [vmem:[%s3461_s5 + $0x10] sm:$0xff] %v1948_v60 }
 0x5fc   :  { %v1953_v61 = vpop.permute.xlu1 %1952 }
 0x5fd   :  { %1958 = vst [vmem:[%s3461_s5 + $0x18] sm:$0xff] %v1953_v61 }
 0x5fe   :  { %1963 = vsyncmov [#allocation4] }
 0x601   :  { %s1964_s8 = vpop.sfrf %1963 }
 0x602   :  { %p2141_p0 = scmp.ne.s32.totalorder %s1964_s8, 0 }
 0x604   :  { %1968 = shalt.err (%p2141_p0)  }

</bundles_post_ra>
